<compile_context>
chip_gen: v7x
topology: tpu7x:2x2x1
jax: 0.10.0
libtpu: 0.0.40
codegen_flags: <defaults>
</compile_context>

<pallas_src>
import numpy as np
import jax
import jax.numpy as jnp
from jax.experimental import pallas as pl
from jax.experimental.pallas import tpu as pltpu

# ---- configuration ----
NUM_CAPS = 8            # also the squash group size (view(B, 1152, -1) -> 8)
OUT_CH = 32
KS = 9
STRIDE = 2
IN_CH = 16              # reduced from 256 for a small, fast test
H = W = 20              # (20 - 9) // 2 + 1 = 6 -> 32 * 6 * 6 = 1152
OH = OW = 6
B = 2

S = OH * OW                          # 36 conv output positions
NROWS = NUM_CAPS * OUT_CH            # 256 flat (cap, oc) rows -> MXU lane dim
HALF = NROWS // 2                    # 128 rows per parity
NGROUPS = 2 * S // NUM_CAPS          # 9 size-8 squash groups per (even, odd) pair
K = IN_CH * KS * KS                  # 1296 contraction length
K_PAD = pl.cdiv(K + 1, 128) * 128    # 1408 (room for the bias row, lane aligned)


# ---------------------------- Pallas kernel -----------------------------
def primary_caps_kernel(p_ref, w_ref, get_ref, got_ref, ge_ref, go_ref, o_ref):
    """Fused conv(8 capsules) + bias + grouped squash, both batch elements.

    p_ref  : (B*S, K_PAD)  bf16 im2col patches (+ a 1.0 bias column at col K)
    w_ref  : (K_PAD, 256)  bf16 W^T, columns parity-split [even R | odd R],
                           row K holds the biases
    get_ref: (B*9, B*S)    bf16 block-diag group-sum matrix (even rows)
    got_ref: (B*9, B*S)    bf16 block-diag group-sum matrix (odd rows)
    ge_ref : (B*S, B*9)    bf16 block-diag broadcast-back matrix (even rows)
    go_ref : (B*S, B*9)    bf16 block-diag broadcast-back matrix (odd rows)
    o_ref  : (B*S, 256)    f32 squashed output, columns [even R | odd R]
    """
    # Conv + bias for all 8 capsules and both batch elements: one bf16 MXU
    # matmul with a full 256-wide result (lane) dimension.
    y = jnp.dot(p_ref[...], w_ref[...], preferred_element_type=jnp.float32)
    ye = y[:, :HALF]                       # even (cap*32 + oc) rows
    yo = y[:, HALF:]                       # odd  (cap*32 + oc) rows

    # Squash group sums: one (even, odd) lane pair = 72 consecutive flattened
    # elements = nine size-8 groups, so the group sum is a tiny 0/1 matmul
    # (block-diagonal over the batch), fed in bf16.
    sqe = (ye * ye).astype(jnp.bfloat16)
    sqo = (yo * yo).astype(jnp.bfloat16)
    sq = (jnp.dot(get_ref[...], sqe, preferred_element_type=jnp.float32)
          + jnp.dot(got_ref[...], sqo, preferred_element_type=jnp.float32))   # (B*9, 128)

    # squash scale = sq / ((1 + sq) * sqrt(sq)); rsqrt and the approximate
    # reciprocal both run on the EUP.  1e-20 guards the sq == 0 case (the
    # PyTorch module would NaN there).
    scale = sq * jax.lax.rsqrt(sq + 1e-20) * pl.reciprocal(1.0 + sq, approx=True)
    scale = scale.astype(jnp.bfloat16)

    # Broadcast the per-group scale back (0/1 matmuls) and store each 128-lane
    # half separately so ye/se die before yo/so are produced (vreg pressure).
    se = jnp.dot(ge_ref[...], scale, preferred_element_type=jnp.float32)      # (B*S, 128)
    o_ref[:, :HALF] = ye * se
    so = jnp.dot(go_ref[...], scale, preferred_element_type=jnp.float32)
    o_ref[:, HALF:] = yo * so


# --------------------- host-side grouping matrices ----------------------
def _group_matrices(batch):
    """0/1 squash-grouping matrices, precomputed host-side (resident bf16)."""
    s = np.arange(S)[:, None]
    g = np.arange(NGROUPS)[None, :]
    ge_s = (s // NUM_CAPS == g).astype(np.float32)           # (36, 9) even-row groups
    go_s = ((s + S) // NUM_CAPS == g).astype(np.float32)     # (36, 9) odd-row groups
    eye = np.eye(batch, dtype=np.float32)
    ge = np.kron(eye, ge_s)                                  # (batch*36, batch*9)
    go = np.kron(eye, go_s)
    return (jnp.asarray(ge.T, jnp.bfloat16), jnp.asarray(go.T, jnp.bfloat16),
            jnp.asarray(ge, jnp.bfloat16), jnp.asarray(go, jnp.bfloat16))


# ------------------------------- wrapper --------------------------------
def primary_caps_forward(x, weights, biases):
    """x: (B, IN_CH, H, W); weights: (NUM_CAPS, OUT_CH, IN_CH, KS, KS); biases: (NUM_CAPS, OUT_CH)."""
    batch = x.shape[0]
    rows = batch * S

    # im2col as a single fused XLA op; output channel = ci*81 + kh*9 + kw,
    # matching weights.reshape(256, K).
    # TODO(synk): at full IN_CH=256 fold the stride-2 patch extraction into the
    # kernel with manual strided DMA instead of materializing patches in HBM.
    patches = jax.lax.conv_general_dilated_patches(
        x, filter_shape=(KS, KS), window_strides=(STRIDE, STRIDE),
        padding="VALID", dimension_numbers=("NCHW", "OIHW", "NCHW"))
    p = patches.reshape(batch, K, S).transpose(0, 2, 1).reshape(rows, K)
    p = jnp.pad(p, ((0, 0), (0, K_PAD - K)))
    p = p.at[:, K].set(1.0)                       # pairs with the bias row of W^T
    p = p.astype(jnp.bfloat16)

    # W^T with the biases folded into row K; columns parity-split so lanes
    # [0,128) hold even flat (cap*32 + oc) rows and [128,256) hold odd rows.
    w_all = weights.reshape(NROWS, K)
    w_t = jnp.zeros((K_PAD, NROWS), jnp.float32)
    w_t = w_t.at[:K, :].set(w_all.T)
    w_t = w_t.at[K, :].set(biases.reshape(NROWS))
    w_t = jnp.concatenate([w_t[:, 0::2], w_t[:, 1::2]], axis=1).astype(jnp.bfloat16)

    get_m, got_m, ge_m, go_m = _group_matrices(batch)

    # TODO(synk): at full IN_CH=256 (K=20736) the bf16 weight block is ~10.5 MB;
    # request single-buffering on the resident weight spec (pipeline_mode=
    # pl.Buffered(1)) and/or set vmem_limit_bytes, or tile K with a trailing
    # "arbitrary" grid axis + f32 accumulator.  On v7x, split the 128 column
    # pairs (capsule halves) across the two TensorCores instead of the batch.
    out = pl.pallas_call(
        primary_caps_kernel,
        out_shape=jax.ShapeDtypeStruct((rows, NROWS), jnp.float32),
        grid=(1,),
        in_specs=[
            pl.BlockSpec((rows, K_PAD), lambda i: (0, 0)),            # patches
            pl.BlockSpec((K_PAD, NROWS), lambda i: (0, 0)),           # W^T (resident)
            pl.BlockSpec((batch * NGROUPS, rows), lambda i: (0, 0)),  # group sums (even)
            pl.BlockSpec((batch * NGROUPS, rows), lambda i: (0, 0)),  # group sums (odd)
            pl.BlockSpec((rows, batch * NGROUPS), lambda i: (0, 0)),  # broadcast (even)
            pl.BlockSpec((rows, batch * NGROUPS), lambda i: (0, 0)),  # broadcast (odd)
        ],
        out_specs=pl.BlockSpec((rows, NROWS), lambda i: (0, 0)),
        compiler_params=pltpu.CompilerParams(
            dimension_semantics=("arbitrary",)),
    )(p, w_t, get_m, got_m, ge_m, go_m)

    # Un-split the parity lanes; the transpose is a tiny (295 KB) XLA op and the
    # reshapes are row-major compatible, so this reproduces
    # torch.stack(u, dim=1).view(B, 32*6*6, -1) exactly.
    u = out.reshape(batch, S, 2, HALF).transpose(0, 3, 2, 1)
    return u.reshape(batch, OUT_CH * OH * OW, NUM_CAPS)


# ---------------------------- pure-JAX reference ----------------------------
def ref_forward(x, weights, biases):
    outs = []
    for c in range(NUM_CAPS):
        o = jax.lax.conv_general_dilated(
            x, weights[c], window_strides=(STRIDE, STRIDE), padding="VALID",
            dimension_numbers=("NCHW", "OIHW", "NCHW"),
            precision=jax.lax.Precision.HIGHEST)
        outs.append(o + biases[c][None, :, None, None])
    u = jnp.stack(outs, axis=1)                      # (B, cap, oc, OH, OW)
    u = u.reshape(x.shape[0], OUT_CH * OH * OW, -1)
    sq = jnp.sum(u * u, axis=-1, keepdims=True)
    return sq * u / ((1.0 + sq) * jnp.sqrt(sq))


if __name__ == "__main__":
    key = jax.random.PRNGKey(0)
    kx, kw, kb = jax.random.split(key, 3)
    x = jax.random.normal(kx, (B, IN_CH, H, W), dtype=jnp.float32)
    weights = jax.random.normal(kw, (NUM_CAPS, OUT_CH, IN_CH, KS, KS),
                                dtype=jnp.float32) * 0.05
    biases = jax.random.normal(kb, (NUM_CAPS, OUT_CH), dtype=jnp.float32) * 0.05

    out = jax.jit(primary_caps_forward)(x, weights, biases)
    out = jax.block_until_ready(out)

    assert out.shape == (B, OUT_CH * OH * OW, NUM_CAPS), out.shape
    ref = ref_forward(x, weights, biases)
    # 2e-2 tolerance: the kernel's conv runs on the MXU in bf16 (f32
    # accumulation) per the perf review; the reference is a full-f32 conv.
    assert jnp.allclose(out, ref, atol=2e-2, rtol=2e-2), float(
        jnp.max(jnp.abs(out - ref)))
    print("KERNEL_OK")
</pallas_src>

<mosaic_0001>
module attributes {stable_mosaic.version = 11 : i64} {
  func.func @primary_caps_kernel(%arg0: i32, %arg1: memref<72x1408xbf16, #tpu.memory_space<vmem>>, %arg2: memref<1408x256xbf16, #tpu.memory_space<vmem>>, %arg3: memref<18x72xbf16, #tpu.memory_space<vmem>>, %arg4: memref<18x72xbf16, #tpu.memory_space<vmem>>, %arg5: memref<72x18xbf16, #tpu.memory_space<vmem>>, %arg6: memref<72x18xbf16, #tpu.memory_space<vmem>>, %arg7: memref<72x256xf32, #tpu.memory_space<vmem>>) attributes {dimension_semantics = [#tpu.dimension_semantics<arbitrary>], iteration_bounds = array<i64: 1>, scalar_prefetch = 0 : i64, scratch_operands = 0 : i64, tpu.core_type = #tpu.core_type<tc>, window_params = [{pipeline_mode = #tpu.pipeline_mode<synchronous>, transform_indices = @transform_0, window_bounds = array<i64: 72, 1408>}, {pipeline_mode = #tpu.pipeline_mode<synchronous>, transform_indices = @transform_1, window_bounds = array<i64: 1408, 256>}, {pipeline_mode = #tpu.pipeline_mode<synchronous>, transform_indices = @transform_2, window_bounds = array<i64: 18, 72>}, {pipeline_mode = #tpu.pipeline_mode<synchronous>, transform_indices = @transform_3, window_bounds = array<i64: 18, 72>}, {pipeline_mode = #tpu.pipeline_mode<synchronous>, transform_indices = @transform_4, window_bounds = array<i64: 72, 18>}, {pipeline_mode = #tpu.pipeline_mode<synchronous>, transform_indices = @transform_5, window_bounds = array<i64: 72, 18>}, {pipeline_mode = #tpu.pipeline_mode<synchronous>, transform_indices = @transform_6, window_bounds = array<i64: 72, 256>}]} {
    %c0 = arith.constant 0 : index
    %c0_0 = arith.constant 0 : index
    %0 = vector.load %arg1[%c0, %c0_0] : memref<72x1408xbf16, #tpu.memory_space<vmem>>, vector<72x1408xbf16>
    %c0_1 = arith.constant 0 : index
    %c0_2 = arith.constant 0 : index
    %1 = vector.load %arg2[%c0_1, %c0_2] : memref<1408x256xbf16, #tpu.memory_space<vmem>>, vector<1408x256xbf16>
    %cst = arith.constant dense<0.000000e+00> : vector<72x256xf32>
    %2 = tpu.matmul %0, %1, %cst {dimension_numbers = #tpu.dot_dimension_numbers<[1], [0], [0], [1], [0, 0, 1, 1], [], []>} : vector<72x1408xbf16>, vector<1408x256xbf16>, vector<72x256xf32> -> vector<72x256xf32>
    %3 = vector.extract_strided_slice %2 {offsets = [0, 0], sizes = [72, 128], strides = [1, 1]} : vector<72x256xf32> to vector<72x128xf32>
    %4 = vector.extract_strided_slice %2 {offsets = [0, 128], sizes = [72, 128], strides = [1, 1]} : vector<72x256xf32> to vector<72x128xf32>
    %5 = arith.mulf %3, %3 : vector<72x128xf32>
    %6 = arith.truncf %5 : vector<72x128xf32> to vector<72x128xbf16>
    %7 = arith.mulf %4, %4 : vector<72x128xf32>
    %8 = arith.truncf %7 : vector<72x128xf32> to vector<72x128xbf16>
    %c0_3 = arith.constant 0 : index
    %c0_4 = arith.constant 0 : index
    %9 = vector.load %arg3[%c0_3, %c0_4] : memref<18x72xbf16, #tpu.memory_space<vmem>>, vector<18x72xbf16>
    %cst_5 = arith.constant dense<0.000000e+00> : vector<18x128xf32>
    %10 = tpu.matmul %9, %6, %cst_5 {dimension_numbers = #tpu.dot_dimension_numbers<[1], [0], [0], [1], [0, 0, 1, 1], [], []>} : vector<18x72xbf16>, vector<72x128xbf16>, vector<18x128xf32> -> vector<18x128xf32>
    %c0_6 = arith.constant 0 : index
    %c0_7 = arith.constant 0 : index
    %11 = vector.load %arg4[%c0_6, %c0_7] : memref<18x72xbf16, #tpu.memory_space<vmem>>, vector<18x72xbf16>
    %cst_8 = arith.constant dense<0.000000e+00> : vector<18x128xf32>
    %12 = tpu.matmul %11, %8, %cst_8 {dimension_numbers = #tpu.dot_dimension_numbers<[1], [0], [0], [1], [0, 0, 1, 1], [], []>} : vector<18x72xbf16>, vector<72x128xbf16>, vector<18x128xf32> -> vector<18x128xf32>
    %13 = arith.addf %10, %12 : vector<18x128xf32>
    %cst_9 = arith.constant 9.99999968E-21 : f32
    %14 = vector.broadcast %cst_9 : f32 to vector<18x128xf32>
    %15 = arith.addf %13, %14 : vector<18x128xf32>
    %16 = math.rsqrt %15 : vector<18x128xf32>
    %17 = arith.mulf %13, %16 : vector<18x128xf32>
    %cst_10 = arith.constant 1.000000e+00 : f32
    %18 = vector.broadcast %cst_10 : f32 to vector<18x128xf32>
    %19 = arith.addf %18, %13 : vector<18x128xf32>
    %20 = tpu.reciprocal %19 {approx = true} : vector<18x128xf32> -> vector<18x128xf32>
    %21 = arith.mulf %17, %20 : vector<18x128xf32>
    %22 = arith.truncf %21 : vector<18x128xf32> to vector<18x128xbf16>
    %c0_11 = arith.constant 0 : index
    %c0_12 = arith.constant 0 : index
    %23 = vector.load %arg5[%c0_11, %c0_12] : memref<72x18xbf16, #tpu.memory_space<vmem>>, vector<72x18xbf16>
    %cst_13 = arith.constant dense<0.000000e+00> : vector<72x128xf32>
    %24 = tpu.matmul %23, %22, %cst_13 {dimension_numbers = #tpu.dot_dimension_numbers<[1], [0], [0], [1], [0, 0, 1, 1], [], []>} : vector<72x18xbf16>, vector<18x128xbf16>, vector<72x128xf32> -> vector<72x128xf32>
    %25 = arith.mulf %3, %24 : vector<72x128xf32>
    %c0_14 = arith.constant 0 : index
    %c0_15 = arith.constant 0 : index
    %26 = vector.load %arg7[%c0_14, %c0_15] : memref<72x256xf32, #tpu.memory_space<vmem>>, vector<72x128xf32>
    tpu.vector_store %arg7[%c0_14, %c0_15], %25 {strides = array<i32>} : memref<72x256xf32, #tpu.memory_space<vmem>>, vector<72x128xf32>,
    %c0_16 = arith.constant 0 : index
    %c0_17 = arith.constant 0 : index
    %27 = vector.load %arg6[%c0_16, %c0_17] : memref<72x18xbf16, #tpu.memory_space<vmem>>, vector<72x18xbf16>
    %cst_18 = arith.constant dense<0.000000e+00> : vector<72x128xf32>
    %28 = tpu.matmul %27, %22, %cst_18 {dimension_numbers = #tpu.dot_dimension_numbers<[1], [0], [0], [1], [0, 0, 1, 1], [], []>} : vector<72x18xbf16>, vector<18x128xbf16>, vector<72x128xf32> -> vector<72x128xf32>
    %29 = arith.mulf %4, %28 : vector<72x128xf32>
    %c0_19 = arith.constant 0 : index
    %c128 = arith.constant 128 : index
    %30 = vector.load %arg7[%c0_19, %c128] : memref<72x256xf32, #tpu.memory_space<vmem>>, vector<72x128xf32>
    tpu.vector_store %arg7[%c0_19, %c128], %29 {strides = array<i32>} : memref<72x256xf32, #tpu.memory_space<vmem>>, vector<72x128xf32>,
    return
  }
  func.func @transform_0(%arg0: i32) -> (i32, i32) {
    %c0_i32 = arith.constant 0 : i32
    %c0_i32_0 = arith.constant 0 : i32
    %c0_i32_1 = arith.constant 0 : i32
    return %c0_i32, %c0_i32_0 : i32, i32
  }
  func.func @transform_1(%arg0: i32) -> (i32, i32) {
    %c0_i32 = arith.constant 0 : i32
    %c0_i32_0 = arith.constant 0 : i32
    %c0_i32_1 = arith.constant 0 : i32
    return %c0_i32, %c0_i32_0 : i32, i32
  }
  func.func @transform_2(%arg0: i32) -> (i32, i32) {
    %c0_i32 = arith.constant 0 : i32
    %c0_i32_0 = arith.constant 0 : i32
    %c0_i32_1 = arith.constant 0 : i32
    return %c0_i32, %c0_i32_0 : i32, i32
  }
  func.func @transform_3(%arg0: i32) -> (i32, i32) {
    %c0_i32 = arith.constant 0 : i32
    %c0_i32_0 = arith.constant 0 : i32
    %c0_i32_1 = arith.constant 0 : i32
    return %c0_i32, %c0_i32_0 : i32, i32
  }
  func.func @transform_4(%arg0: i32) -> (i32, i32) {
    %c0_i32 = arith.constant 0 : i32
    %c0_i32_0 = arith.constant 0 : i32
    %c0_i32_1 = arith.constant 0 : i32
    return %c0_i32, %c0_i32_0 : i32, i32
  }
  func.func @transform_5(%arg0: i32) -> (i32, i32) {
    %c0_i32 = arith.constant 0 : i32
    %c0_i32_0 = arith.constant 0 : i32
    %c0_i32_1 = arith.constant 0 : i32
    return %c0_i32, %c0_i32_0 : i32, i32
  }
  func.func @transform_6(%arg0: i32) -> (i32, i32) {
    %c0_i32 = arith.constant 0 : i32
    %c0_i32_0 = arith.constant 0 : i32
    %c0_i32_1 = arith.constant 0 : i32
    return %c0_i32, %c0_i32_0 : i32, i32
  }
}

</mosaic_0001>

<bundles_post_ra>
// kernel: primary_caps_forward.1
= control target key start
LH: loop header
LB: loop body
LE: loop exit
PB: predicated region body
PF: predicated region fallthrough
CT: control target
= control target key end

     0   :  { %vm1925_vm0 = vcmask 588800   ;;  %vm1932_vm1 = vcmask 1043456   ;;  %vm3189_vm2 = vmmov 0   ;;  %vm2117_vm3 = vcmask 1040384   ;;  %s4131_s1 = inlined_call_operand.vmem [shape: bf16[1408,256], index: 1, kind: input, shape index: {}]   ;;  %s4132_s0 = inlined_call_operand.vmem [shape: bf16[72,1408], index: 0, kind: input, shape index: {}]   ;;  %s4133_s3 = inlined_call_operand.vmem [shape: bf16[18,72], index: 3, kind: input, shape index: {}]   ;;  %s4134_s2 = inlined_call_operand.vmem [shape: bf16[18,72], index: 2, kind: input, shape index: {}]   ;;  %s4135_s4 = inlined_call_operand.vmem [shape: bf16[72,18], index: 4, kind: input, shape index: {}]   ;;  %s4136_s5 = inlined_call_operand.vmem [shape: bf16[72,18], index: 5, kind: input, shape index: {}]   ;;  %s4137_s6 = inlined_call_operand.vmem [shape: f32[72,256], index: 6, kind: output, shape index: {}]  }
   0x1   :  { %v2822_v0 = vld [vmem:[%s4131_s1 + $0x204] ss:$8 sps:$4 sm:$0xff]   ;;  %v2824_v1 = vld [vmem:[%s4131_s1 + $0x200] ss:$8 sps:$4 sm:$0xff]   ;;  %v2825_v2 = vld [vmem:[%s4131_s1 + $0x214] ss:$8 sps:$4 sm:$0xff]  }
   0x2   :  { %1559 = vmatprep.subr.bf16.mxu0 %v2822_v0  ;;  %v2827_v3 = vld [vmem:[%s4131_s1 + $0x210] ss:$8 sps:$4 sm:$0xff]   ;;  %v2828_v4 = vld [vmem:[%s4131_s1 + $0x224] ss:$8 sps:$4 sm:$0xff]   ;;  %v2830_v5 = vld [vmem:[%s4131_s1 + $0x220] ss:$8 sps:$4 sm:$0xff]  }
   0x3   :  { %1560 = vmatpush1.bf16.msra.mxu0 %v2824_v1  ;;  %v2831_v6 = vld [vmem:[%s4131_s1 + $0x234] ss:$8 sps:$4 sm:$0xff]   ;;  %v2833_v7 = vld [vmem:[%s4131_s1 + $0x230] ss:$8 sps:$4 sm:$0xff]   ;;  %v2834_v8 = vld [vmem:[%s4131_s1 + $0x244] ss:$8 sps:$4 sm:$0xff]  }
   0x4   :  { %1561 = vmatprep.subr.bf16.mxu0 %v2825_v2  ;;  %v2852_v9 = vld [vmem:[%s4131_s1 + $0x4] ss:$8 sps:$4 sm:$0xff]   ;;  %v2854_v10 = vld [vmem:[%s4131_s1] ss:$8 sps:$4 sm:$0xff]   ;;  %v2837_v12 = vld [vmem:[%s4131_s1 + $0x254] ss:$8 sps:$4 sm:$0xff]  }
   0x5   :  { %v2836_v11 = vld [vmem:[%s4131_s1 + $0x240] ss:$8 sps:$4 sm:$0xff]   ;;  %1397 = vmatprep.subr.bf16.mxu1 %v2852_v9  ;;  %v2858_v13 = vld [vmem:[%s4131_s1 + $0x14] ss:$8 sps:$4 sm:$0xff]   ;;  %v2860_v14 = vld [vmem:[%s4131_s1 + $0x10] ss:$8 sps:$4 sm:$0xff]  }
   0x6   :  { %1398 = vmatpush1.bf16.msra.mxu1 %v2854_v10  ;;  %v2839_v15 = vld [vmem:[%s4131_s1 + $0x250] ss:$8 sps:$4 sm:$0xff]   ;;  %v2864_v16 = vld [vmem:[%s4131_s1 + $0x24] ss:$8 sps:$4 sm:$0xff]   ;;  %v2866_v18 = vld [vmem:[%s4131_s1 + $0x20] ss:$8 sps:$4 sm:$0xff]  }
   0x7   :  { %1562 = vmatpush1.bf16.msra.mxu0 %v2827_v3  ;;  %1399 = vmatprep.subr.bf16.mxu1 %v2858_v13  ;;  %v2840_v17 = vld [vmem:[%s4131_s1 + $0x264] ss:$8 sps:$4 sm:$0xff]   ;;  %v2870_v19 = vld [vmem:[%s4131_s1 + $0x34] ss:$8 sps:$4 sm:$0xff]   ;;  %v2842_v20 = vld [vmem:[%s4131_s1 + $0x260] ss:$8 sps:$4 sm:$0xff]  }
   0x8   :  { %1563 = vmatprep.subr.bf16.mxu0 %v2828_v4  ;;  %v2843_v21 = vld [vmem:[%s4131_s1 + $0x274] ss:$8 sps:$4 sm:$0xff]   ;;  %v2872_v22 = vld [vmem:[%s4131_s1 + $0x30] ss:$8 sps:$4 sm:$0xff]   ;;  %v2876_v23 = vld [vmem:[%s4131_s1 + $0x44] ss:$8 sps:$4 sm:$0xff]  }
   0x9   :  { %v2845_v24 = vld [vmem:[%s4131_s1 + $0x270] ss:$8 sps:$4 sm:$0xff]   ;;  %v2846_v25 = vld [vmem:[%s4131_s1 + $0x284] ss:$8 sps:$4 sm:$0xff]   ;;  %v2878_v26 = vld [vmem:[%s4131_s1 + $0x40] ss:$8 sps:$4 sm:$0xff]  }
   0xa   :  { %1400 = vmatpush1.bf16.msra.mxu1 %v2860_v14  ;;  %v2882_v27 = vld [vmem:[%s4131_s1 + $0x54] ss:$8 sps:$4 sm:$0xff]   ;;  %v2848_v28 = vld [vmem:[%s4131_s1 + $0x280] ss:$8 sps:$4 sm:$0xff]   ;;  %v2884_v31 = vld [vmem:[%s4131_s1 + $0x50] ss:$8 sps:$4 sm:$0xff]  }
   0xb   :  { %1564 = vmatpush1.bf16.msra.mxu0 %v2830_v5  ;;  %1401 = vmatprep.subr.bf16.mxu1 %v2864_v16  ;;  %v2893_v29 = vld [vmem:[%s4132_s0 + $0x14] ss:$44 sps:$4 sm:$0xff]   ;;  %v2888_v32 = vld [vmem:[%s4131_s1 + $0x64] ss:$8 sps:$4 sm:$0xff]   ;;  %v2851_v33 = vld [vmem:[%s4131_s1 + $0x290] ss:$8 sps:$4 sm:$0xff]  }
   0xc   :  { %1565 = vmatprep.subr.bf16.mxu0 %v2831_v6  ;;  %v2849_v30 = vld [vmem:[%s4131_s1 + $0x294] ss:$8 sps:$4 sm:$0xff]   ;;  %1591 = vmatprep.mubr.bf16.mxu0 %v2893_v29  ;;  %v2855_v34 = vld [vmem:[%s4131_s1 + $0x2a4] ss:$8 sps:$4 sm:$0xff]   ;;  %v2890_v35 = vld [vmem:[%s4131_s1 + $0x60] ss:$8 sps:$4 sm:$0xff]  }
   0xd   :  { %v2897_v36 = vld [vmem:[%s4131_s1 + $0x74] ss:$8 sps:$4 sm:$0xff]   ;;  %v2857_v37 = vld [vmem:[%s4131_s1 + $0x2a0] ss:$8 sps:$4 sm:$0xff]   ;;  %v2899_v39 = vld [vmem:[%s4131_s1 + $0x70] ss:$8 sps:$4 sm:$0xff]  }
   0xe   :  { %1402 = vmatpush1.bf16.msra.mxu1 %v2866_v18  ;;  %v2861_v38 = vld [vmem:[%s4131_s1 + $0x2b4] ss:$8 sps:$4 sm:$0xff]   ;;  %v2903_v40 = vld [vmem:[%s4131_s1 + $0x84] ss:$8 sps:$4 sm:$0xff]   ;;  %v2863_v41 = vld [vmem:[%s4131_s1 + $0x2b0] ss:$8 sps:$4 sm:$0xff]  }
   0xf   :  { %1566 = vmatpush1.bf16.msra.mxu0 %v2833_v7  ;;  %1403 = vmatprep.subr.bf16.mxu1 %v2870_v19  ;;  %v2867_v42 = vld [vmem:[%s4131_s1 + $0x2c4] ss:$8 sps:$4 sm:$0xff]   ;;  %v2905_v43 = vld [vmem:[%s4131_s1 + $0x80] ss:$8 sps:$4 sm:$0xff]   ;;  %v2909_v44 = vld [vmem:[%s4131_s1 + $0x94] ss:$8 sps:$4 sm:$0xff]  }
  0x10   :  { %1567 = vmatprep.subr.bf16.mxu0 %v2834_v8  ;;  %v2869_v45 = vld [vmem:[%s4131_s1 + $0x2c0] ss:$8 sps:$4 sm:$0xff]   ;;  %v2873_v46 = vld [vmem:[%s4131_s1 + $0x2d4] ss:$8 sps:$4 sm:$0xff]   ;;  %v2911_v47 = vld [vmem:[%s4131_s1 + $0x90] ss:$8 sps:$4 sm:$0xff]  }
  0x11   :  { %v2915_v48 = vld [vmem:[%s4131_s1 + $0xa4] ss:$8 sps:$4 sm:$0xff]   ;;  %v2875_v49 = vld [vmem:[%s4131_s1 + $0x2d0] ss:$8 sps:$4 sm:$0xff]   ;;  %v2917_v51 = vld [vmem:[%s4131_s1 + $0xa0] ss:$8 sps:$4 sm:$0xff]  }
  0x12   :  { %1404 = vmatpush1.bf16.msra.mxu1 %v2872_v22  ;;  %v2879_v50 = vld [vmem:[%s4131_s1 + $0x2e4] ss:$8 sps:$4 sm:$0xff]   ;;  %v2921_v52 = vld [vmem:[%s4131_s1 + $0xb4] ss:$8 sps:$4 sm:$0xff]   ;;  %v2881_v53 = vld [vmem:[%s4131_s1 + $0x2e0] ss:$8 sps:$4 sm:$0xff]  }
  0x13   :  { %1568 = vmatpush1.bf16.msra.mxu0 %v2836_v11  ;;  %1405 = vmatprep.subr.bf16.mxu1 %v2876_v23  ;;  %v2885_v54 = vld [vmem:[%s4131_s1 + $0x2f4] ss:$8 sps:$4 sm:$0xff]   ;;  %v2923_v55 = vld [vmem:[%s4131_s1 + $0xb0] ss:$8 sps:$4 sm:$0xff]   ;;  %v2927_v56 = vld [vmem:[%s4131_s1 + $0xc4] ss:$8 sps:$4 sm:$0xff]  }
  0x14   :  { %1569 = vmatprep.subr.bf16.mxu0 %v2837_v12  ;;  %v2887_v57 = vld [vmem:[%s4131_s1 + $0x2f0] ss:$8 sps:$4 sm:$0xff]   ;;  %v2896_v60 = vld [vmem:[%s4131_s1 + $0x304] ss:$8 sps:$4 sm:$0xff]   ;;  %v2929_v61 = vld [vmem:[%s4131_s1 + $0xc0] ss:$8 sps:$4 sm:$0xff]  }
  0x15   :  { %v2956_v58 = vld [vmem:[%s4132_s0 + $0x4] ss:$44 sps:$4 sm:$0xff]   ;;  %v2933_v62 = vld [vmem:[%s4131_s1 + $0xd4] ss:$8 sps:$4 sm:$0xff]   ;;  %v2894_v63 = vld [vmem:[%s4131_s1 + $0x300] ss:$8 sps:$4 sm:$0xff]  }
  0x16   :  { %1406 = vmatpush1.bf16.msra.mxu1 %v2878_v26  ;;  %v2891_v59 = vld [vmem:[%s4132_s0 + $0x10] ss:$44 sps:$4 sm:$0xff]   ;;  %1429 = vmatprep.mubr.bf16.mxu1 %v2956_v58  ;;  %v2942_v0 = vld [vmem:[%s4132_s0 + $0x6c] ss:$44 sps:$4 sm:$0xff]   ;;  %v2941_v6 = vld [vmem:[%s4131_s1 + $0xe0] ss:$8 sps:$4 sm:$0xff]  }
  0x17   :  { %1570 = vmatpush1.bf16.msra.mxu0 %v2839_v15  ;;  %1407 = vmatprep.subr.bf16.mxu1 %v2882_v27  ;;  %v2902_v1 = vld [vmem:[%s4131_s1 + $0x314] ss:$8 sps:$4 sm:$0xff]   ;;  %v2935_v2 = vld [vmem:[%s4131_s1 + $0xd0] ss:$8 sps:$4 sm:$0xff]   ;;  %v2939_v3 = vld [vmem:[%s4131_s1 + $0xe4] ss:$8 sps:$4 sm:$0xff]  }
  0x18   :  { %1571 = vmatprep.subr.bf16.mxu0 %v2840_v17  ;;  %v2900_v4 = vld [vmem:[%s4131_s1 + $0x310] ss:$8 sps:$4 sm:$0xff]   ;;  %v2908_v5 = vld [vmem:[%s4131_s1 + $0x324] ss:$8 sps:$4 sm:$0xff]   ;;  %v2947_v7 = vld [vmem:[%s4132_s0 + $0x68] ss:$44 sps:$4 sm:$0xff]  }
  0x19   :  { %v2948_v8 = vld [vmem:[%s4131_s1 + $0xf4] ss:$8 sps:$4 sm:$0xff]   ;;  %v2906_v9 = vld [vmem:[%s4131_s1 + $0x320] ss:$8 sps:$4 sm:$0xff]   ;;  %v2960_v10 = vld [vmem:[%s4132_s0 + $0xc4] ss:$44 sps:$4 sm:$0xff]  }
  0x1a   :  { %1408 = vmatpush1.bf16.msra.mxu1 %v2884_v31  ;;  %v2914_v11 = vld [vmem:[%s4131_s1 + $0x334] ss:$8 sps:$4 sm:$0xff]   ;;  %v2950_v12 = vld [vmem:[%s4131_s1 + $0xf0] ss:$8 sps:$4 sm:$0xff]   ;;  %v2959_v14 = vld [vmem:[%s4131_s1 + $0x104] ss:$8 sps:$4 sm:$0xff]  }
  0x1b   :  { %1572 = vmatpush1.bf16.msra.mxu0 %v2842_v20  ;;  %1409 = vmatprep.subr.bf16.mxu1 %v2888_v32  ;;  %v2912_v13 = vld [vmem:[%s4131_s1 + $0x330] ss:$8 sps:$4 sm:$0xff]   ;;  %v2920_v15 = vld [vmem:[%s4131_s1 + $0x344] ss:$8 sps:$4 sm:$0xff]   ;;  %v2918_v17 = vld [vmem:[%s4131_s1 + $0x340] ss:$8 sps:$4 sm:$0xff]  }
  0x1c   :  { %1573 = vmatprep.subr.bf16.mxu0 %v2843_v21  ;;  %v2954_v16 = vld [vmem:[%s4132_s0] ss:$44 sps:$4 sm:$0xff]   ;;  %v2968_v20 = vld [vmem:[%s4131_s1 + $0x114] ss:$8 sps:$4 sm:$0xff]   ;;  %v2966_v23 = vld [vmem:[%s4131_s1 + $0x110] ss:$8 sps:$4 sm:$0xff]  }
  0x1d   :  { %v2957_v18 = vld [vmem:[%s4131_s1 + $0x100] ss:$8 sps:$4 sm:$0xff]   ;;  %v2926_v22 = vld [vmem:[%s4131_s1 + $0x354] ss:$8 sps:$4 sm:$0xff]   ;;  %v2932_v26 = vld [vmem:[%s4131_s1 + $0x364] ss:$8 sps:$4 sm:$0xff]  }
  0x1e   :  { %1410 = vmatpush1.bf16.msra.mxu1 %v2890_v35  ;;  %v2965_v19 = vld [vmem:[%s4132_s0 + $0xc0] ss:$44 sps:$4 sm:$0xff]   ;;  %v2975_v21 = vld [vmem:[%s4132_s0 + $0x11c] ss:$44 sps:$4 sm:$0xff]   ;;  %v74_v27 = vld [vmem:[%s4132_s0 + $0x170] sm:$0xff]  ;;  %vm2101_vm4 = vcmask 146432  }
  0x1f   :  { %1574 = vmatpush1.bf16.msra.mxu0 %v2845_v24  ;;  %1411 = vmatprep.subr.bf16.mxu1 %v2897_v36  ;;  %v2924_v24 = vld [vmem:[%s4131_s1 + $0x350] ss:$8 sps:$4 sm:$0xff]   ;;  %v2972_v29 = vld [vmem:[%s4131_s1 + $0x120] ss:$8 sps:$4 sm:$0xff]   ;;  %v2983_v31 = vld [vmem:[%s4131_s1 + $0x134] ss:$8 sps:$4 sm:$0xff]  }
  0x20   :  { %1575 = vmatprep.subr.bf16.mxu0 %v2846_v25  ;;  %v2974_v25 = vld [vmem:[%s4131_s1 + $0x124] ss:$8 sps:$4 sm:$0xff]   ;;  %v3016_v32 = vld [vmem:[%s4132_s0 + $0x5c] ss:$44 sps:$4 sm:$0xff]   ;;  %v2981_v36 = vld [vmem:[%s4131_s1 + $0x130] ss:$8 sps:$4 sm:$0xff]  }
  0x21   :  { %v3018_v35 = vld [vmem:[%s4132_s0 + $0x58] ss:$44 sps:$4 sm:$0xff]  }
  0x22   :  { %1412 = vmatpush1.bf16.msra.mxu1 %v2899_v39  ;;  %v2946_v39 = vld [vmem:[%s4131_s1 + $0x384] ss:$8 sps:$4 sm:$0xff]   ;;  %v3010_v58 = vld [vmem:[%s4131_s1 + $0x170] ss:$8 sps:$4 sm:$0xff]  }
  0x23   :  { %1576 = vmatpush1.bf16.msra.mxu0 %v2848_v28  ;;  %1413 = vmatprep.subr.bf16.mxu1 %v2903_v40  ;;  %v2930_v28 = vld [vmem:[%s4131_s1 + $0x360] ss:$8 sps:$4 sm:$0xff]  }
  0x24   :  { %1577 = vmatprep.subr.bf16.mxu0 %v2849_v30  ;;  %v2980_v30 = vld [vmem:[%s4132_s0 + $0x118] ss:$44 sps:$4 sm:$0xff]   ;;  %v2944_v40 = vld [vmem:[%s4131_s1 + $0x380] ss:$8 sps:$4 sm:$0xff]  }
  0x26   :  { %1414 = vmatpush1.bf16.msra.mxu1 %v2905_v43  ;;  %v2953_v43 = vld [vmem:[%s4131_s1 + $0x394] ss:$8 sps:$4 sm:$0xff]  }
  0x27   :  { %1578 = vmatpush1.bf16.msra.mxu0 %v2851_v33  ;;  %1415 = vmatprep.subr.bf16.mxu1 %v2909_v44  ;;  %v2938_v33 = vld [vmem:[%s4131_s1 + $0x374] ss:$8 sps:$4 sm:$0xff]   ;;  %v2400_v44 = vcombine.low %v74_v27, %v74_v27 }
  0x28   :  { %1579 = vmatprep.subr.bf16.mxu0 %v2855_v34  ;;  %v2401_v34 = vcombine.high %v74_v27, %v74_v27  ;;  %v3024_v27 = vld [vmem:[%s4131_s1 + $0x424] ss:$8 sps:$4 sm:$0xff]  }
  0x2a   :  { %1416 = vmatpush1.bf16.msra.mxu1 %v2911_v47  ;;  %v3033_v47 = vld [vmem:[%s4132_s0 + $0xb0] ss:$44 sps:$4 sm:$0xff]  }
  0x2b   :  { %1580 = vmatpush1.bf16.msra.mxu0 %v2857_v37  ;;  %1417 = vmatprep.subr.bf16.mxu1 %v2915_v48  ;;  %v2989_v37 = vld [vmem:[%s4131_s1 + $0x144] ss:$8 sps:$4 sm:$0xff]   ;;  %v2995_v48 = vld [vmem:[%s4131_s1 + $0x150] ss:$8 sps:$4 sm:$0xff]  }
  0x2c   :  { %1581 = vmatprep.subr.bf16.mxu0 %v2861_v38  ;;  %v2936_v38 = vld [vmem:[%s4131_s1 + $0x370] ss:$8 sps:$4 sm:$0xff]  }
  0x2e   :  { %1418 = vmatpush1.bf16.msra.mxu1 %v2917_v51  ;;  %v3046_v51 = vld [vmem:[%s4132_s0 + $0x10c] ss:$44 sps:$4 sm:$0xff]  }
  0x2f   :  { %1582 = vmatpush1.bf16.msra.mxu0 %v2863_v41  ;;  %1419 = vmatprep.subr.bf16.mxu1 %v2921_v52  ;;  %v2987_v41 = vld [vmem:[%s4131_s1 + $0x140] ss:$8 sps:$4 sm:$0xff]   ;;  %v2964_v52 = vld [vmem:[%s4131_s1 + $0x3a4] ss:$8 sps:$4 sm:$0xff]  }
  0x30   :  { %1583 = vmatprep.subr.bf16.mxu0 %v2867_v42  ;;  %v3031_v42 = vld [vmem:[%s4132_s0 + $0xb4] ss:$44 sps:$4 sm:$0xff]  }
  0x32   :  { %1420 = vmatpush1.bf16.msra.mxu1 %v2923_v55  ;;  %v3012_v55 = vld [vmem:[%s4131_s1 + $0x174] ss:$8 sps:$4 sm:$0xff]  }
  0x33   :  { %1584 = vmatpush1.bf16.msra.mxu0 %v2869_v45  ;;  %1421 = vmatprep.subr.bf16.mxu1 %v2927_v56  ;;  %v2997_v45 = vld [vmem:[%s4131_s1 + $0x154] ss:$8 sps:$4 sm:$0xff]  }
  0x34   :  { %1585 = vmatprep.subr.bf16.mxu0 %v2873_v46  ;;  %v3006_v46 = vld [vmem:[%s4132_s0 + $0x1c] ss:$44 sps:$4 sm:$0xff]  }
  0x35   :  { %v2971_v56 = vld [vmem:[%s4131_s1 + $0x3b4] ss:$8 sps:$4 sm:$0xff]  }
  0x36   :  { %1422 = vmatpush1.bf16.msra.mxu1 %v2929_v61 }
  0x37   :  { %1586 = vmatpush1.bf16.msra.mxu0 %v2875_v49  ;;  %1423 = vmatprep.subr.bf16.mxu1 %v2933_v62  ;;  %v2951_v49 = vld [vmem:[%s4131_s1 + $0x390] ss:$8 sps:$4 sm:$0xff]  }
  0x38   :  { %1587 = vmatprep.subr.bf16.mxu0 %v2879_v50  ;;  %v3003_v50 = vld [vmem:[%s4131_s1 + $0x164] ss:$8 sps:$4 sm:$0xff]   ;;  %v2969_v62 = vld [vmem:[%s4131_s1 + $0x3b0] ss:$8 sps:$4 sm:$0xff]  }
  0x3a   :  { %1424 = vmatpush1.bf16.msra.mxu1 %v2935_v2  ;;  %v2977_v2 = vld [vmem:[%s4131_s1 + $0x3c0] ss:$8 sps:$4 sm:$0xff]  }
  0x3b   :  { %1588 = vmatpush1.bf16.msra.mxu0 %v2881_v53  ;;  %1425 = vmatprep.subr.bf16.mxu1 %v2939_v3  ;;  %v3001_v53 = vld [vmem:[%s4131_s1 + $0x160] ss:$8 sps:$4 sm:$0xff]   ;;  %v2986_v3 = vld [vmem:[%s4131_s1 + $0x3d4] ss:$8 sps:$4 sm:$0xff]  }
  0x3c   :  { %1589 = vmatprep.subr.bf16.mxu0 %v2885_v54  ;;  %v2962_v54 = vld [vmem:[%s4131_s1 + $0x3a0] ss:$8 sps:$4 sm:$0xff]  }
  0x3e   :  { %1426 = vmatpush1.bf16.msra.mxu1 %v2941_v6  ;;  %v3080_v6 = vld [vmem:[%s4132_s0 + $0xc] ss:$44 sps:$4 sm:$0xff]  }
  0x3f   :  { %1590 = vmatpush1.bf16.msra.mxu0 %v2887_v57  ;;  %1427 = vmatprep.subr.bf16.mxu1 %v2948_v8  ;;  %v3048_v57 = vld [vmem:[%s4132_s0 + $0x108] ss:$44 sps:$4 sm:$0xff]   ;;  %v2984_v8 = vld [vmem:[%s4131_s1 + $0x3d0] ss:$8 sps:$4 sm:$0xff]  }
  0x40   :  { %1640 = vmatprep.subr.bf16.mxu0 %v2896_v60  ;;  %v3021_v60 = vld [vmem:[%s4131_s1 + $0x184] ss:$8 sps:$4 sm:$0xff]  }
  0x42   :  { %1592 = vmatmul.mubr.bf16.vlgmr.msra.gmra.mrb[0].mxu0 %v2891_v59  ;;  %1428 = vmatpush1.bf16.msra.mxu1 %v2950_v12  ;;  %v72_v59 = vld [vmem:[%s4132_s0 + $0x160] sm:$0xff] }
  0x43   :  { %1641 = vmatpush1.bf16.msra.mxu0 %v2894_v63  ;;  %1601 = vmatprep.mubr.bf16.mxu0 %v2942_v0  ;;  %v2397_v61 = vcombine.high %v72_v59, %v72_v59  ;;  %v2979_v63 = vld [vmem:[%s4131_s1 + $0x3c4] ss:$8 sps:$4 sm:$0xff]   ;;  %v3019_v0 = vld [vmem:[%s4131_s1 + $0x180] ss:$8 sps:$4 sm:$0xff]  }
  0x44   :  { %1642 = vmatprep.subr.bf16.mxu0 %v2902_v1  ;;  %1478 = vmatprep.subr.bf16.mxu1 %v2959_v14  ;;  %v3027_v1 = vld [vmem:[%s4131_s1 + $0x194] ss:$8 sps:$4 sm:$0xff]   ;;  %v2991_v12 = vld [vmem:[%s4131_s1 + $0x3e0] ss:$8 sps:$4 sm:$0xff]   ;;  %v3040_v14 = vld [vmem:[%s4131_s1 + $0x1b0] ss:$8 sps:$4 sm:$0xff]  }
  0x45   :  { %1430 = vmatmul.mubr.bf16.vlgmr.msra.gmra.mrb[0].mxu1 %v2954_v16  ;;  %v2998_v16 = vld [vmem:[%s4131_s1 + $0x3f0] ss:$8 sps:$4 sm:$0xff]  }
  0x46   :  { %1479 = vmatpush1.bf16.msra.mxu1 %v2957_v18  ;;  %1439 = vmatprep.mubr.bf16.mxu1 %v3016_v32  ;;  %v3009_v18 = vld [vmem:[%s4131_s1 + $0x404] ss:$8 sps:$4 sm:$0xff]  }
  0x47   :  { %1643 = vmatpush1.bf16.msra.mxu0 %v2900_v4  ;;  %1480 = vmatprep.subr.bf16.mxu1 %v2968_v20  ;;  %v2396_v4 = vcombine.low %v72_v59, %v72_v59  ;;  %v3057_v20 = vld [vmem:[%s4131_s1 + $0x1d4] ss:$8 sps:$4 sm:$0xff]   ;;  %v3081_v32 = vld [vmem:[%s4132_s0 + $0xcc] ss:$44 sps:$4 sm:$0xff]  }
  0x48   :  { %1644 = vmatprep.subr.bf16.mxu0 %v2908_v5  ;;  %v3025_v5 = vld [vmem:[%s4131_s1 + $0x190] ss:$8 sps:$4 sm:$0xff]   ;;  %v3077_v59 = vld [vmem:[%s4131_s1 + $0x494] ss:$8 sps:$4 sm:$0xff]  }
  0x4a   :  { %1602 = vmatmul.mubr.bf16.gmra.mrb[4].mxu0 %v2947_v7  ;;  %1481 = vmatpush1.bf16.msra.mxu1 %v2966_v23  ;;  %v3036_v7 = vld [vmem:[%s4131_s1 + $0x1a4] ss:$8 sps:$4 sm:$0xff]   ;;  %v3015_v23 = vld [vmem:[%s4131_s1 + $0x414] ss:$8 sps:$4 sm:$0xff]  }
  0x4b   :  { %1645 = vmatpush1.bf16.msra.mxu0 %v2906_v9  ;;  %1611 = vmatprep.mubr.bf16.mxu0 %v2960_v10  ;;  %v2993_v9 = vld [vmem:[%s4131_s1 + $0x3e4] ss:$8 sps:$4 sm:$0xff]   ;;  %v3034_v10 = vld [vmem:[%s4131_s1 + $0x1a0] ss:$8 sps:$4 sm:$0xff]  }
  0x4c   :  { %1646 = vmatprep.subr.bf16.mxu0 %v2914_v11  ;;  %1482 = vmatprep.subr.bf16.mxu1 %v2974_v25  ;;  %v3042_v11 = vld [vmem:[%s4131_s1 + $0x1b4] ss:$8 sps:$4 sm:$0xff]   ;;  %v3065_v25 = vld [vmem:[%s4131_s1 + $0x1e4] ss:$8 sps:$4 sm:$0xff]  }
  0x4d   :  { %1440 = vmatmul.mubr.bf16.gmra.mrb[4].mxu1 %v3018_v35  ;;  %v3028_v35 = vld [vmem:[%s4131_s1 + $0x430] ss:$8 sps:$4 sm:$0xff]  }
  0x4e   :  { %1483 = vmatpush1.bf16.msra.mxu1 %v2972_v29  ;;  %1449 = vmatprep.mubr.bf16.mxu1 %v3031_v42  ;;  %v3068_v29 = vld [vmem:[%s4132_s0 + $0x70] ss:$44 sps:$4 sm:$0xff]  }
  0x4f   :  { %1647 = vmatpush1.bf16.msra.mxu0 %v2912_v13  ;;  %1484 = vmatprep.subr.bf16.mxu1 %v2983_v31  ;;  %v3000_v13 = vld [vmem:[%s4131_s1 + $0x3f4] ss:$8 sps:$4 sm:$0xff]   ;;  %v3022_v31 = vld [vmem:[%s4131_s1 + $0x420] ss:$8 sps:$4 sm:$0xff]  }
  0x50   :  { %1648 = vmatprep.subr.bf16.mxu0 %v2920_v15  ;;  %v3051_v15 = vld [vmem:[%s4131_s1 + $0x1c4] ss:$8 sps:$4 sm:$0xff]   ;;  %v3045_v42 = vld [vmem:[%s4131_s1 + $0x454] ss:$8 sps:$4 sm:$0xff]  }
  0x52   :  { %1612 = vmatmul.mubr.bf16.gmra.mrb[8].mxu0 %v2965_v19  ;;  %1485 = vmatpush1.bf16.msra.mxu1 %v2981_v36  ;;  %v3049_v19 = vld [vmem:[%s4131_s1 + $0x1c0] ss:$8 sps:$4 sm:$0xff]   ;;  %v3039_v36 = vld [vmem:[%s4131_s1 + $0x444] ss:$8 sps:$4 sm:$0xff]  }
  0x53   :  { %1649 = vmatpush1.bf16.msra.mxu0 %v2918_v17  ;;  %1621 = vmatprep.mubr.bf16.mxu0 %v2975_v21  ;;  %v3004_v17 = vld [vmem:[%s4132_s0 + $0x18] ss:$44 sps:$4 sm:$0xff]   ;;  %v3007_v21 = vld [vmem:[%s4131_s1 + $0x400] ss:$8 sps:$4 sm:$0xff]  }
  0x54   :  { %1650 = vmatprep.subr.bf16.mxu0 %v2926_v22  ;;  %1486 = vmatprep.subr.bf16.mxu1 %v2989_v37  ;;  %v3066_v22 = vld [vmem:[%s4132_s0 + $0x74] ss:$44 sps:$4 sm:$0xff]  }
  0x55   :  { %1450 = vmatmul.mubr.bf16.gmra.mrb[8].mxu1 %v3033_v47  ;;  %v3078_v37 = vld [vmem:[%s4132_s0 + $0x8] ss:$44 sps:$4 sm:$0xff]  }
  0x56   :  { %1487 = vmatpush1.bf16.msra.mxu1 %v2987_v41  ;;  %1459 = vmatprep.mubr.bf16.mxu1 %v3046_v51  ;;  %v3090_v41 = vld [vmem:[%s4132_s0 + $0x124] ss:$44 sps:$4 sm:$0xff]   ;;  %v3122_v47 = vld [vmem:[%s4132_s0 + $0xbc] ss:$44 sps:$4 sm:$0xff]  }
  0x57   :  { %1651 = vmatpush1.bf16.msra.mxu0 %v2924_v24  ;;  %1488 = vmatprep.subr.bf16.mxu1 %v2997_v45  ;;  %v3055_v24 = vld [vmem:[%s4131_s1 + $0x1d0] ss:$8 sps:$4 sm:$0xff]   ;;  %v3060_v51 = vld [vmem:[%s4131_s1 + $0x474] ss:$8 sps:$4 sm:$0xff]  }
  0x58   :  { %1652 = vmatprep.subr.bf16.mxu0 %v2932_v26  ;;  %v3013_v26 = vld [vmem:[%s4131_s1 + $0x410] ss:$8 sps:$4 sm:$0xff]  }
  0x59   :  { %v75_v45 = vld [vmem:[%s4132_s0 + $0x178] sm:$0xff] }
  0x5a   :  { %1622 = vmatmul.mubr.bf16.gmra.mrb[12].mxu0 %v2980_v30  ;;  %1489 = vmatpush1.bf16.msra.mxu1 %v2995_v48  ;;  %v3074_v30 = vld [vmem:[%s4131_s1 + $0x1f4] ss:$8 sps:$4 sm:$0xff]   ;;  %v3092_v48 = vld [vmem:[%s4132_s0 + $0x120] ss:$44 sps:$4 sm:$0xff]  }
  0x5b   :  { %1653 = vmatpush1.bf16.msra.mxu0 %v2930_v28  ;;  %1631 = vmatprep.mubr.bf16.mxu0 %v2401_v34  ;;  %v3063_v28 = vld [vmem:[%s4131_s1 + $0x1e0] ss:$8 sps:$4 sm:$0xff]   ;;  %v3072_v34 = vld [vmem:[%s4131_s1 + $0x1f0] ss:$8 sps:$4 sm:$0xff]  }
  0x5c   :  { %1654 = vmatprep.subr.bf16.mxu0 %v2938_v33  ;;  %1490 = vmatprep.subr.bf16.mxu1 %v3003_v50  ;;  %v3030_v33 = vld [vmem:[%s4131_s1 + $0x434] ss:$8 sps:$4 sm:$0xff]   ;;  %v2403_v50 = vcombine.high %v75_v45, %v75_v45 }
  0x5d   :  { %1460 = vmatmul.mubr.bf16.gmra.mrb[12].mxu1 %v3048_v57  ;;  %v3069_v57 = vld [vmem:[%s4131_s1 + $0x480] ss:$8 sps:$4 sm:$0xff]  }
  0x5e   :  { %1491 = vmatpush1.bf16.msra.mxu1 %v3001_v53  ;;  %1469 = vmatprep.mubr.bf16.mxu1 %v2397_v61  ;;  %v3071_v53 = vld [vmem:[%s4131_s1 + $0x484] ss:$8 sps:$4 sm:$0xff]   ;;  %v3075_v61 = vld [vmem:[%s4131_s1 + $0x490] ss:$8 sps:$4 sm:$0xff]  }
  0x5f   :  { %1655 = vmatpush1.bf16.msra.mxu0 %v2936_v38  ;;  %1492 = vmatprep.subr.bf16.mxu1 %v3012_v55  ;;  %v3110_v38 = vld [vmem:[%s4132_s0 + $0x64] ss:$44 sps:$4 sm:$0xff]   ;;  %v3131_v55 = vld [vmem:[%s4132_s0 + $0x114] ss:$44 sps:$4 sm:$0xff]  }
  0x60   :  { %1656 = vmatprep.subr.bf16.mxu0 %v2946_v39  ;;  %v3037_v39 = vld [vmem:[%s4131_s1 + $0x440] ss:$8 sps:$4 sm:$0xff]  }
  0x62   :  { %1632 = vmatmul.mubr.bf16.gmra.mrb[16].mxu0 %v2400_v44  ;;  %1493 = vmatpush1.bf16.msra.mxu1 %v3010_v58  ;;  %v3054_v44 = vld [vmem:[%s4131_s1 + $0x464] ss:$8 sps:$4 sm:$0xff]  }
  0x63   :  { %1657 = vmatpush1.bf16.msra.mxu0 %v2944_v40  ;;  %1672 = vmatprep.mubr.bf16.mxu0 %v3006_v46  ;;  %v3083_v40 = vld [vmem:[%s4132_s0 + $0xc8] ss:$44 sps:$4 sm:$0xff]   ;;  %v3112_v46 = vld [vmem:[%s4132_s0 + $0x60] ss:$44 sps:$4 sm:$0xff]   ;;  %v3109_v58 = vld [vmem:[%s4132_s0 + $0x24] ss:$44 sps:$4 sm:$0xff]  }
  0x64   :  { %1658 = vmatprep.subr.bf16.mxu0 %v2953_v43  ;;  %1494 = vmatprep.subr.bf16.mxu1 %v3021_v60  ;;  %v3043_v43 = vld [vmem:[%s4131_s1 + $0x450] ss:$8 sps:$4 sm:$0xff]   ;;  %v73_v60 = vld [vmem:[%s4132_s0 + $0x168] sm:$0xff] }
  0x65   :  { %1470 = vmatmul.mubr.bf16.gmra.mrb[16].mxu1 %v2396_v4  ;;  %v3095_v4 = vld [vmem:[%s4131_s1 + $0x4c4] ss:$8 sps:$4 sm:$0xff]  }
  0x66   :  { %1495 = vmatpush1.bf16.msra.mxu1 %v3019_v0  ;;  %1510 = vmatprep.mubr.bf16.mxu1 %v3080_v6  ;;  %v2399_v0 = vcombine.high %v73_v60, %v73_v60  ;;  %v3093_v6 = vld [vmem:[%s4131_s1 + $0x4c0] ss:$8 sps:$4 sm:$0xff]  }
  0x67   :  { %1659 = vmatpush1.bf16.msra.mxu0 %v2951_v49  ;;  %1496 = vmatprep.subr.bf16.mxu1 %v3027_v1  ;;  %v3052_v49 = vld [vmem:[%s4131_s1 + $0x460] ss:$8 sps:$4 sm:$0xff]  }
  0x68   :  { %1660 = vmatprep.subr.bf16.mxu0 %v2964_v52  ;;  %v3058_v52 = vld [vmem:[%s4131_s1 + $0x470] ss:$8 sps:$4 sm:$0xff]   ;;  %v3084_v1 = vld [vmem:[%s4131_s1 + $0x4a0] ss:$8 sps:$4 sm:$0xff]  }
  0x6a   :  { %1497 = vmatpush1.bf16.msra.mxu1 %v3025_v5  ;;  %v2398_v5 = vcombine.low %v73_v60, %v73_v60 }
  0x6b   :  { %1661 = vmatpush1.bf16.msra.mxu0 %v2962_v54  ;;  %1498 = vmatprep.subr.bf16.mxu1 %v3036_v7  ;;  %v3124_v54 = vld [vmem:[%s4132_s0 + $0xb8] ss:$44 sps:$4 sm:$0xff]   ;;  %v3098_v7 = vld [vmem:[%s4131_s1 + $0x4d4] ss:$8 sps:$4 sm:$0xff]  }
  0x6c   :  { %1662 = vmatprep.subr.bf16.mxu0 %v2971_v56  ;;  %v2402_v56 = vcombine.low %v75_v45, %v75_v45 }
  0x6e   :  { %1499 = vmatpush1.bf16.msra.mxu1 %v3034_v10  ;;  %v3101_v10 = vld [vmem:[%s4131_s1 + $0x4e0] ss:$8 sps:$4 sm:$0xff]  }
  0x6f   :  { %1663 = vmatpush1.bf16.msra.mxu0 %v2969_v62  ;;  %1500 = vmatprep.subr.bf16.mxu1 %v3042_v11  ;;  %v3086_v62 = vld [vmem:[%s4131_s1 + $0x4a4] ss:$8 sps:$4 sm:$0xff]   ;;  %v3106_v11 = vld [vmem:[%s4131_s1 + $0x4f4] ss:$8 sps:$4 sm:$0xff]  }
  0x70   :  { %1664 = vmatprep.subr.bf16.mxu0 %v2979_v63  ;;  %v3136_v63 = vld [vmem:[%s4132_s0 + $0x110] ss:$44 sps:$4 sm:$0xff]  }
  0x72   :  { %1501 = vmatpush1.bf16.msra.mxu1 %v3040_v14  ;;  %v3107_v14 = vld [vmem:[%s4132_s0 + $0x20] ss:$44 sps:$4 sm:$0xff]  }
  0x73   :  { %1665 = vmatpush1.bf16.msra.mxu0 %v2977_v2  ;;  %1502 = vmatprep.subr.bf16.mxu1 %v3051_v15  ;;  %v3089_v2 = vld [vmem:[%s4131_s1 + $0x4b4] ss:$8 sps:$4 sm:$0xff]   ;;  %v3113_v15 = vld [vmem:[%s4131_s1 + $0x500] ss:$8 sps:$4 sm:$0xff]  }
  0x74   :  { %1666 = vmatprep.subr.bf16.mxu0 %v2986_v3  ;;  %v3087_v3 = vld [vmem:[%s4131_s1 + $0x4b0] ss:$8 sps:$4 sm:$0xff]  }
  0x76   :  { %1503 = vmatpush1.bf16.msra.mxu1 %v3049_v19  ;;  %v3129_v19 = vld [vmem:[%s4131_s1 + $0x524] ss:$8 sps:$4 sm:$0xff]  }
  0x77   :  { %1667 = vmatpush1.bf16.msra.mxu0 %v2984_v8  ;;  %1504 = vmatprep.subr.bf16.mxu1 %v3057_v20  ;;  %v3096_v8 = vld [vmem:[%s4131_s1 + $0x4d0] ss:$8 sps:$4 sm:$0xff]  }
  0x78   :  { %1668 = vmatprep.subr.bf16.mxu0 %v2993_v9  ;;  %v3103_v9 = vld [vmem:[%s4131_s1 + $0x4e4] ss:$8 sps:$4 sm:$0xff]  }
  0x79   :  { %v3118_v20 = vld [vmem:[%s4132_s0 + $0x78] ss:$44 sps:$4 sm:$0xff]  }
  0x7a   :  { %1505 = vmatpush1.bf16.msra.mxu1 %v3055_v24  ;;  %v3133_v24 = vld [vmem:[%s4131_s1 + $0x530] ss:$8 sps:$4 sm:$0xff]  }
  0x7b   :  { %1669 = vmatpush1.bf16.msra.mxu0 %v2991_v12  ;;  %1506 = vmatprep.subr.bf16.mxu1 %v3065_v25  ;;  %v3104_v12 = vld [vmem:[%s4131_s1 + $0x4f0] ss:$8 sps:$4 sm:$0xff]   ;;  %v3142_v25 = vld [vmem:[%s4131_s1 + $0x544] ss:$8 sps:$4 sm:$0xff]  }
  0x7c   :  { %1670 = vmatprep.subr.bf16.mxu0 %v3000_v13  ;;  %v3115_v13 = vld [vmem:[%s4131_s1 + $0x504] ss:$8 sps:$4 sm:$0xff]  }
  0x7e   :  { %1507 = vmatpush1.bf16.msra.mxu1 %v3063_v28  ;;  %v3140_v28 = vld [vmem:[%s4131_s1 + $0x540] ss:$8 sps:$4 sm:$0xff]  }
  0x7f   :  { %1671 = vmatpush1.bf16.msra.mxu0 %v2998_v16  ;;  %1508 = vmatprep.subr.bf16.mxu1 %v3074_v30  ;;  %v3116_v16 = vld [vmem:[%s4132_s0 + $0x7c] ss:$44 sps:$4 sm:$0xff]   ;;  %v3144_v30 = vld [vmem:[%s4131_s1 + $0x550] ss:$8 sps:$4 sm:$0xff]  }
  0x80   :  { %1721 = vmatprep.subr.bf16.mxu0 %v3009_v18  ;;  %v3119_v18 = vld [vmem:[%s4131_s1 + $0x510] ss:$8 sps:$4 sm:$0xff]  }
  0x82   :  { %1673 = vmatmul.mubr.bf16.vlgmr.msra.gmra.mrb[0].mxu0 %v3004_v17  ;;  %1509 = vmatpush1.bf16.msra.mxu1 %v3072_v34  ;;  %v3121_v17 = vld [vmem:[%s4131_s1 + $0x514] ss:$8 sps:$4 sm:$0xff]  }
  0x83   :  { %1722 = vmatpush1.bf16.msra.mxu0 %v3007_v21  ;;  %1682 = vmatprep.mubr.bf16.mxu0 %v3066_v22  ;;  %v3125_v21 = vld [vmem:[%s4132_s0 + $0xd4] ss:$44 sps:$4 sm:$0xff]  }
  0x84   :  { %1723 = vmatprep.subr.bf16.mxu0 %v3015_v23  ;;  %v3127_v22 = vld [vmem:[%s4131_s1 + $0x520] ss:$8 sps:$4 sm:$0xff]   ;;  %v3135_v23 = vld [vmem:[%s4131_s1 + $0x534] ss:$8 sps:$4 sm:$0xff]  }
  0x85   :  { %1511 = vmatmul.mubr.bf16.vlgmr.msra.gmra.mrb[0].mxu1 %v3078_v37  ;;  %v3153_v37 = vld [vmem:[%s4131_s1 + $0x570] ss:$8 sps:$4 sm:$0xff]  }
  0x86   :  { %1520 = vmatprep.mubr.bf16.mxu1 %v3110_v38 }
  0x87   :  { %1724 = vmatpush1.bf16.msra.mxu0 %v3013_v26  ;;  %v3130_v26 = vld [vmem:[%s4132_s0 + $0xd0] ss:$44 sps:$4 sm:$0xff]  }
  0x88   :  { %1725 = vmatprep.subr.bf16.mxu0 %v3024_v27  ;;  %v3137_v27 = vld [vmem:[%s4132_s0 + $0x12c] ss:$44 sps:$4 sm:$0xff]  }
  0x8a   :  { %1683 = vmatmul.mubr.bf16.gmra.mrb[4].mxu0 %v3068_v29  ;;  %v3146_v29 = vld [vmem:[%s4131_s1 + $0x554] ss:$8 sps:$4 sm:$0xff]  }
  0x8b   :  { %1726 = vmatpush1.bf16.msra.mxu0 %v3022_v31  ;;  %1692 = vmatprep.mubr.bf16.mxu0 %v3081_v32  ;;  %v76_v31 = vld [vmem:[%s4132_s0 + $0x180] sm:$0xff] }
  0x8c   :  { %1727 = vmatprep.subr.bf16.mxu0 %v3030_v33  ;;  %v3152_v32 = vld [vmem:[%s4131_s1 + $0x564] ss:$8 sps:$4 sm:$0xff]   ;;  %v3139_v33 = vld [vmem:[%s4132_s0 + $0x128] ss:$44 sps:$4 sm:$0xff]   ;;  %v2405_v34 = vcombine.high %v76_v31, %v76_v31  ;;  %v2404_v38 = vcombine.low %v76_v31, %v76_v31 }
  0x8d   :  { %1521 = vmatmul.mubr.bf16.gmra.mrb[4].mxu1 %v3112_v46 }
  0x8e   :  { %1530 = vmatprep.mubr.bf16.mxu1 %v3122_v47 }
  0x8f   :  { %1728 = vmatpush1.bf16.msra.mxu0 %v3028_v35  ;;  %v3150_v35 = vld [vmem:[%s4131_s1 + $0x560] ss:$8 sps:$4 sm:$0xff]  }
  0x90   :  { %1729 = vmatprep.subr.bf16.mxu0 %v3039_v36  ;;  %v3155_v36 = vld [vmem:[%s4131_s1 + $0x574] ss:$8 sps:$4 sm:$0xff]  }
  0x92   :  { %1693 = vmatmul.mubr.bf16.gmra.mrb[8].mxu0 %v3083_v40  ;;  %v3156_v40 = vld [vmem:[%s4132_s0 + $0x28] ss:$44 sps:$4 sm:$0xff]  }
  0x93   :  { %1730 = vmatpush1.bf16.msra.mxu0 %v3037_v39  ;;  %1702 = vmatprep.mubr.bf16.mxu0 %v3090_v41  ;;  %v3187_v39 = vmov 0   ;;  %v3157_v41 = vld [vmem:[%s4132_s0 + $0x80] ss:$44 sps:$4 sm:$0xff]  }
  0x94   :  { %1731 = vmatprep.subr.bf16.mxu0 %v3045_v42  ;;  %v3158_v42 = vld [vmem:[%s4132_s0 + $0xd8] ss:$44 sps:$4 sm:$0xff]  }
  0x95   :  { %1531 = vmatmul.mubr.bf16.gmra.mrb[8].mxu1 %v3124_v54 }
  0x96   :  { %1540 = vmatprep.mubr.bf16.mxu1 %v3131_v55 }
  0x97   :  { %1732 = vmatpush1.bf16.msra.mxu0 %v3043_v43  ;;  %v3159_v43 = vld [vmem:[%s4132_s0 + $0x130] ss:$44 sps:$4 sm:$0xff]  }
  0x98   :  { %1733 = vmatprep.subr.bf16.mxu0 %v3054_v44  ;;  %v3160_v44 = vld [vmem:[%s4132_s0 + $0x188] ss:$0 sps:$4 sm:$0xff]  }
  0x9a   :  { %1703 = vmatmul.mubr.bf16.gmra.mrb[12].mxu0 %v3092_v48 }
  0x9b   :  { %1734 = vmatpush1.bf16.msra.mxu0 %v3052_v49  ;;  %1712 = vmatprep.mubr.bf16.mxu0 %v2403_v50  ;;  %v3161_v49 = vld [vmem:[%s4133_s3] sm:$0xff]  }
  0x9c   :  { %1735 = vmatprep.subr.bf16.mxu0 %v3060_v51 }
  0x9d   :  { %1541 = vmatmul.mubr.bf16.gmra.mrb[12].mxu1 %v3136_v63 }
  0x9e   :  { %1550 = vmatprep.mubr.bf16.mxu1 %v2399_v0 }
  0x9f   :  { %1736 = vmatpush1.bf16.msra.mxu0 %v3058_v52 }
  0xa0   :  { %1737 = vmatprep.subr.bf16.mxu0 %v3071_v53 }
  0xa2   :  { %1713 = vmatmul.mubr.bf16.gmra.mrb[16].mxu0 %v2402_v56 }
  0xa3   :  { %1738 = vmatpush1.bf16.msra.mxu0 %v3069_v57  ;;  %1753 = vmatprep.mubr.bf16.mxu0 %v3109_v58 }
  0xa4   :  { %1739 = vmatprep.subr.bf16.mxu0 %v3077_v59 }
  0xa5   :  { %1551 = vmatmul.mubr.bf16.gmra.mrb[16].mxu1 %v2398_v5 }
  0xa6   :  { %2649 = vmatprep.mubr.msk.bf16.mxu1 %vm1925_vm0, %v3161_v49 }
  0xa7   :  { %1740 = vmatpush1.bf16.msra.mxu0 %v3075_v61 }
  0xa8   :  { %1741 = vmatprep.subr.bf16.mxu0 %v3086_v62 }
  0xab   :  { %1742 = vmatpush1.bf16.msra.mxu0 %v3084_v1 }
  0xac   :  { %1743 = vmatprep.subr.bf16.mxu0 %v3089_v2 }
  0xaf   :  { %1744 = vmatpush1.bf16.msra.mxu0 %v3087_v3 }
  0xb0   :  { %1745 = vmatprep.subr.bf16.mxu0 %v3095_v4 }
  0xb3   :  { %1746 = vmatpush1.bf16.msra.mxu0 %v3093_v6 }
  0xb4   :  { %1747 = vmatprep.subr.bf16.mxu0 %v3098_v7 }
  0xb7   :  { %1748 = vmatpush1.bf16.msra.mxu0 %v3096_v8 }
  0xb8   :  { %1749 = vmatprep.subr.bf16.mxu0 %v3103_v9 }
  0xbb   :  { %1750 = vmatpush1.bf16.msra.mxu0 %v3101_v10 }
  0xbc   :  { %1751 = vmatprep.subr.bf16.mxu0 %v3106_v11 }
  0xbf   :  { %1752 = vmatpush1.bf16.msra.mxu0 %v3104_v12 }
  0xc0   :  { %1802 = vmatprep.subr.bf16.mxu0 %v3115_v13 }
  0xc2   :  { %1754 = vmatmul.mubr.bf16.vlgmr.msra.gmra.mrb[0].mxu0 %v3107_v14 }
  0xc3   :  { %1803 = vmatpush1.bf16.msra.mxu0 %v3113_v15  ;;  %1763 = vmatprep.mubr.bf16.mxu0 %v3116_v16 }
  0xc4   :  { %1804 = vmatprep.subr.bf16.mxu0 %v3121_v17 }
  0xc7   :  { %1805 = vmatpush1.bf16.msra.mxu0 %v3119_v18 }
  0xc8   :  { %1806 = vmatprep.subr.bf16.mxu0 %v3129_v19 }
  0xca   :  { %1764 = vmatmul.mubr.bf16.gmra.mrb[4].mxu0 %v3118_v20 }
  0xcb   :  { %1773 = vmatprep.mubr.bf16.mxu0 %v3125_v21  ;;  %1807 = vmatpush1.bf16.msra.mxu0 %v3127_v22 }
  0xcc   :  { %1808 = vmatprep.subr.bf16.mxu0 %v3135_v23 }
  0xcf   :  { %1809 = vmatpush1.bf16.msra.mxu0 %v3133_v24 }
  0xd0   :  { %1810 = vmatprep.subr.bf16.mxu0 %v3142_v25 }
  0xd2   :  { %1774 = vmatmul.mubr.bf16.gmra.mrb[8].mxu0 %v3130_v26 }
  0xd3   :  { %1783 = vmatprep.mubr.bf16.mxu0 %v3137_v27  ;;  %1811 = vmatpush1.bf16.msra.mxu0 %v3140_v28 }
  0xd4   :  { %1812 = vmatprep.subr.bf16.mxu0 %v3146_v29 }
  0xd7   :  { %1813 = vmatpush1.bf16.msra.mxu0 %v3144_v30 }
  0xd8   :  { %1814 = vmatprep.subr.bf16.mxu0 %v3152_v32 }
  0xda   :  { %1784 = vmatmul.mubr.bf16.gmra.mrb[12].mxu0 %v3139_v33 }
  0xdb   :  { %1793 = vmatprep.mubr.bf16.mxu0 %v2405_v34  ;;  %1815 = vmatpush1.bf16.msra.mxu0 %v3150_v35 }
  0xdc   :  { %1816 = vmatprep.subr.bf16.mxu0 %v3155_v36 }
  0xdf   :  { %1817 = vmatpush1.bf16.msra.mxu0 %v3153_v37 }
  0xe2   :  { %1794 = vmatmul.mubr.bf16.gmra.mrb[16].mxu0 %v2404_v38 }
  0xe3   :  { %1834 = vmatprep.mubr.bf16.mxu0 %v3187_v39 }
  0xea   :  { %1835 = vmatmul.mubr.bf16.vlgmr.msra.gmra.mrb[0].mxu0 %v3156_v40 }
  0xeb   :  { %1844 = vmatprep.mubr.bf16.mxu0 %v3187_v39 }
  0xf2   :  { %1845 = vmatmul.mubr.bf16.gmra.mrb[4].mxu0 %v3157_v41 }
  0xf3   :  { %1854 = vmatprep.mubr.bf16.mxu0 %v3187_v39 }
  0xfa   :  { %1855 = vmatmul.mubr.bf16.gmra.mrb[8].mxu0 %v3158_v42 }
  0xfb   :  { %1864 = vmatprep.mubr.bf16.mxu0 %v3187_v39 }
 0x102   :  { %1865 = vmatmul.mubr.bf16.gmra.mrb[12].mxu0 %v3159_v43 }
 0x103   :  { %1874 = vmatprep.mubr.bf16.mxu0 %v3187_v39 }
 0x10a   :  { %1875 = vmatmul.mubr.bf16.gmra.mrb[16].mxu0 %v3160_v44 }
 0x158   :  { %v1512_v45 = vpop.f32.mrb[0].mxu1 }
 0x159   :  { %v1514_v46 = vpop.f32.mrb[1].mxu1 }
 0x15a   :  { %v1516_v47 = vpop.f32.mrb[2].mxu1 }
 0x15b   :  { %v1518_v48 = vpop.f32.mrb[3].mxu1 }
 0x160   :  { %v1522_v50 = vpop.f32.mrb[4].mxu1 }
 0x161   :  { %v1524_v51 = vpop.f32.mrb[5].mxu1 }
 0x162   :  { %v1526_v52 = vpop.f32.mrb[6].mxu1 }
 0x163   :  { %v1528_v53 = vpop.f32.mrb[7].mxu1 }
 0x168   :  { %v1532_v54 = vpop.f32.mrb[8].mxu1 }
 0x169   :  { %v1534_v55 = vpop.f32.mrb[9].mxu1 }
 0x16a   :  { %v1536_v56 = vpop.f32.mrb[10].mxu1 }
 0x16b   :  { %v1538_v57 = vpop.f32.mrb[11].mxu1 }
 0x170   :  { %v1542_v58 = vpop.f32.mrb[12].mxu1 }
 0x171   :  { %v1544_v59 = vpop.f32.mrb[13].mxu1 }
 0x172   :  { %v1546_v60 = vpop.f32.mrb[14].mxu1 }
 0x173   :  { %v1548_v61 = vpop.f32.mrb[15].mxu1 }
 0x178   :  { %v1552_v62 = vpop.f32.mrb[16].mxu1 }
 0x179   :  { %v1554_v63 = vpop.f32.mrb[17].mxu1 }
 0x17a   :  { %v1556_v0 = vpop.f32.mrb[18].mxu1 }
 0x17b   :  { %v1557_v1 = vpop.f32.mrb[19].mxu1 }
 0x1bd   :  { %v1836_v2 = vpop.f32.mrb[0].mxu0 }
 0x1be   :  { %v3907_v3 = vadd.f32 %v1836_v2, %v1512_v45  ;;  %v1838_v4 = vpop.f32.mrb[1].mxu0 }
 0x1bf   :  { %v3909_v5 = vadd.f32 %v1838_v4, %v1514_v46  ;;  %v1840_v6 = vpop.f32.mrb[2].mxu0 }
 0x1c0   :  { %v3911_v7 = vadd.f32 %v1840_v6, %v1516_v47  ;;  %v1842_v8 = vpop.f32.mrb[3].mxu0 }
 0x1c1   :  { %v3913_v9 = vadd.f32 %v1842_v8, %v1518_v48  ;;  %v1897_v10 = vmul.f32 %v3909_v5, %v3909_v5 }
 0x1c3   :  { %v1898_v11 = vmul.f32 %v3913_v9, %v3913_v9 }
 0x1c5   :  { %v1846_v12 = vpop.f32.mrb[4].mxu0  ;;  %v1906_v13 = vpack.c.bf16 %v1898_v11, %v1897_v10 }
 0x1c6   :  { %v3919_v14 = vadd.f32 %v1846_v12, %v1522_v50  ;;  %v1848_v15 = vpop.f32.mrb[5].mxu0  ;;  %v3164_v12 = vld [vmem:[%s4134_s2 + $0x8] ss:$0 sps:$4 sm:$0x11]  }
 0x1c7   :  { %v3921_v16 = vadd.f32 %v1848_v15, %v1524_v51  ;;  %v1850_v17 = vpop.f32.mrb[6].mxu0  ;;  %2639 = vmatprep.subr.bf16.mxu1 %v1906_v13 }
 0x1c8   :  { %v3923_v18 = vadd.f32 %v1850_v17, %v1526_v52  ;;  %v1852_v19 = vpop.f32.mrb[7].mxu0  ;;  %2640 = vmatpush3.bf16.msra.mxu1 %v1906_v13  ;;  %v1884_v52 = vmul.f32 %v3911_v7, %v3911_v7  ;;  %v3188_v13 = vmov 0.0  }
 0x1c9   :  { %v3925_v20 = vadd.f32 %v1852_v19, %v1528_v53  ;;  %v1899_v21 = vmul.f32 %v3921_v16, %v3921_v16 }
 0x1cb   :  { %v1900_v22 = vmul.f32 %v3925_v20, %v3925_v20 }
 0x1cd   :  { %v1856_v23 = vpop.f32.mrb[8].mxu0  ;;  %v1907_v24 = vpack.c.bf16 %v1900_v22, %v1899_v21 }
 0x1ce   :  { %v3931_v25 = vadd.f32 %v1856_v23, %v1532_v54  ;;  %v1858_v26 = vpop.f32.mrb[9].mxu0  ;;  %v1883_v54 = vmul.f32 %v3907_v3, %v3907_v3 }
 0x1cf   :  { %v3933_v27 = vadd.f32 %v1858_v26, %v1534_v55  ;;  %v1860_v28 = vpop.f32.mrb[10].mxu0  ;;  %2641 = vmatprep.subr.bf16.mxu1 %v1907_v24 }
 0x1d0   :  { %v3935_v29 = vadd.f32 %v1860_v28, %v1536_v56  ;;  %v1862_v30 = vpop.f32.mrb[11].mxu0  ;;  %2642 = vmatpush3.bf16.msra.mxu1 %v1907_v24  ;;  %v1886_v56 = vmul.f32 %v3923_v18, %v3923_v18  ;;  %v1887_v0 = vmul.f32 %v3931_v25, %v3931_v25 }
 0x1d1   :  { %v3937_v31 = vadd.f32 %v1862_v30, %v1538_v57  ;;  %v1901_v32 = vmul.f32 %v3933_v27, %v3933_v27 }
 0x1d3   :  { %v1902_v33 = vmul.f32 %v3937_v31, %v3937_v31 }
 0x1d5   :  { %v1866_v34 = vpop.f32.mrb[12].mxu0  ;;  %v1908_v35 = vpack.c.bf16 %v1902_v33, %v1901_v32 }
 0x1d6   :  { %v3943_v36 = vadd.f32 %v1866_v34, %v1542_v58  ;;  %v1868_v37 = vpop.f32.mrb[13].mxu0  ;;  %v1892_v58 = vpack.c.bf16 %v1884_v52, %v1883_v54  ;;  %v3166_v54 = vld [vmem:[%s4135_s4 + $0x8] sm:$0xff]  }
 0x1d7   :  { %v3945_v38 = vadd.f32 %v1868_v37, %v1544_v59  ;;  %v1870_v39 = vpop.f32.mrb[14].mxu0  ;;  %2643 = vmatprep.subr.bf16.mxu1 %v1908_v35  ;;  %v3162_v59 = vld [vmem:[%s4133_s3 + $0x8] ss:$0 sps:$4 sm:$0x11]  }
 0x1d8   :  { %v3947_v40 = vadd.f32 %v1870_v39, %v1546_v60  ;;  %v1872_v41 = vpop.f32.mrb[15].mxu0  ;;  %2644 = vmatpush3.bf16.msra.mxu1 %v1908_v35  ;;  %v3163_v60 = vld [vmem:[%s4134_s2] sm:$0xff]   ;;  %v1889_v4 = vmul.f32 %v3943_v36, %v3943_v36 }
 0x1d9   :  { %v3949_v42 = vadd.f32 %v1872_v41, %v1548_v61  ;;  %v1903_v43 = vmul.f32 %v3945_v38, %v3945_v38  ;;  %v1885_v61 = vmul.f32 %v3919_v14, %v3919_v14 }
 0x1da   :  { %v1890_v1 = vmul.f32 %v3947_v40, %v3947_v40 }
 0x1db   :  { %v1904_v44 = vmul.f32 %v3949_v42, %v3949_v42 }
 0x1dc   :  { %v1895_v8 = vpack.c.bf16 %v1890_v1, %v1889_v4 }
 0x1dd   :  { %v1876_v45 = vpop.f32.mrb[16].mxu0  ;;  %v1909_v46 = vpack.c.bf16 %v1904_v44, %v1903_v43 }
 0x1de   :  { %v3955_v47 = vadd.f32 %v1876_v45, %v1552_v62  ;;  %v1878_v48 = vpop.f32.mrb[17].mxu0  ;;  %v1888_v62 = vmul.f32 %v3935_v29, %v3935_v29 }
 0x1df   :  { %v3957_v49 = vadd.f32 %v1878_v48, %v1554_v63  ;;  %v1880_v50 = vpop.f32.mrb[18].mxu0  ;;  %2645 = vmatprep.subr.bf16.mxu1 %v1909_v46  ;;  %v1893_v63 = vpack.c.bf16 %v1886_v56, %v1885_v61  ;;  %v3168_v56 = vld [vmem:[%s4135_s4 + $0x18] sm:$0xff]  }
 0x1e0   :  { %v1881_v51 = vpop.f32.mrb[19].mxu0  ;;  %2646 = vmatpush3.bf16.msra.mxu1 %v1909_v46  ;;  %v1894_v2 = vpack.c.bf16 %v1888_v62, %v1887_v0  ;;  %v1891_v6 = vmul.f32 %v3955_v47, %v3955_v47  ;;  %v3173_v61 = vld [vmem:[%s4136_s5 + $0x18] sm:$0xff]   ;;  %v3174_v62 = vld [vmem:[%s4136_s5 + $0x20] ss:$0 sps:$4 sm:$0xff]  }
 0x1e1   :  { %v1905_v53 = vmul.f32 %v3957_v49, %v3957_v49 }
 0x1e2   :  { %v1896_v10 = vpack.c.bf16 %v1891_v6, %v1891_v6 }
 0x1e3   :  { %v1910_v55 = vpack.c.bf16 %v1905_v53, %v1905_v53  ;;  %v3165_v53 = vld [vmem:[%s4135_s4] sm:$0xff]  }
 0x1e4   :  { %v1999_v11 = vsel %vm1932_vm1, %v1896_v10, 0 }
 0x1e5   :  { %2817 = vmatprep.subr.msk.bf16.mxu1 %vm1932_vm1, %v1910_v55  ;;  %v1934_v57 = vsel %vm1932_vm1, %v1910_v55, 0  ;;  %v3167_v55 = vld [vmem:[%s4135_s4 + $0x10] sm:$0xff]  }
 0x1e6   :  { %2648 = vmatpush3.bf16.msra.mxu1 %v1934_v57  ;;  %v3169_v57 = vld [vmem:[%s4135_s4 + $0x20] ss:$0 sps:$4 sm:$0xff]  }
 0x1e7   :  { %2653 = vmatprep.subr.bf16.mxu1 %v1892_v58 }
 0x1e9   :  { %2650 = vmatmul.mubr.msk.bf16.vlgmr.msra.gmra.mrb[20].mxu1 %vm1925_vm0, %v3162_v59  ;;  %v3171_v59 = vld [vmem:[%s4136_s5 + $0x8] sm:$0xff]  }
 0x1ea   :  { %2654 = vmatpush3.bf16.msra.mxu1 %v1892_v58  ;;  %2663 = vmatprep.mubr.msk.bf16.mxu1 %vm1925_vm0, %v3163_v60  ;;  %v3170_v58 = vld [vmem:[%s4136_s5] sm:$0xff]   ;;  %v3172_v60 = vld [vmem:[%s4136_s5 + $0x10] sm:$0xff]  }
 0x1eb   :  { %2655 = vmatprep.subr.bf16.mxu1 %v1893_v63 }
 0x1ee   :  { %2656 = vmatpush3.bf16.msra.mxu1 %v1893_v63 }
 0x1ef   :  { %2657 = vmatprep.subr.bf16.mxu1 %v1894_v2 }
 0x1f2   :  { %2658 = vmatpush3.bf16.msra.mxu1 %v1894_v2 }
 0x1f3   :  { %2659 = vmatprep.subr.bf16.mxu1 %v1895_v8 }
 0x1f6   :  { %2660 = vmatpush3.bf16.msra.mxu1 %v1895_v8 }
 0x1f7   :  { %2818 = vmatprep.subr.msk.bf16.mxu1 %vm1932_vm1, %v1896_v10 }
 0x1fa   :  { %2662 = vmatpush3.bf16.msra.mxu1 %v1999_v11 }
 0x1fb   :  { %2667 = vmatprep.subr.bf16.mxu1 %v3188_v13 }
 0x1fd   :  { %2664 = vmatmul.mubr.msk.bf16.vlgmr.msra.gmra.mrb[20].mxu1 %vm1925_vm0, %v3164_v12 }
 0x1fe   :  { %2671 = vmatprep.mubr.msk.bf16.mxu1 %vm3189_vm2, %v3188_v13 }
 0x2d0   :  { %v2665_v15 = vpop.f32.mrb[20].mxu1 }
 0x2d1   :  { %v2051_v17 = vadd.f32 1e-20, %v2665_v15  ;;  %v2035_v19 = vpop.f32.mrb[21].mxu1  ;;  %v2060_v21 = vadd.f32 1.0, %v2665_v15 }
 0x2d2   :  { %v2049_v22 = vadd.f32 1e-20, %v2035_v19  ;;  %v2666_v23 = vpop.f32.mrb[22].mxu1  ;;  %v2058_v26 = vadd.f32 1.0, %v2035_v19 }
 0x2d3   :  { %3175 = vrsqrt.f32 %v2051_v17  ;;  %v2038_v24 = vpop.f32.mrb[23].mxu1 }
 0x2d4   :  { %v2050_v28 = vadd.f32 1e-20, %v2038_v24  ;;  %3177 = vrsqrt.f32 %v2049_v22  ;;  %v2059_v30 = vadd.f32 1.0, %v2038_v24 }
 0x2d5   :  { %3179 = vrcp.f32 %v2060_v21 }
 0x2d6   :  { %3181 = vrsqrt.f32 %v2050_v28 }
 0x2d7   :  { %3183 = vrcp.f32 %v2058_v26 }
 0x2d8   :  { %3185 = vrcp.f32 %v2059_v30 }
 0x2dd   :  { %v3176_v32 = vpop.eup %3175 }
 0x2de   :  { %v3178_v33 = vpop.eup %3177  ;;  %v2057_v34 = vmul.f32 %v3176_v32, %v2665_v15 }
 0x2df   :  { %v3180_v35 = vpop.eup %3179  ;;  %v2055_v37 = vmul.f32 %v3178_v33, %v2035_v19 }
 0x2e0   :  { %v3182_v39 = vpop.eup %3181  ;;  %v2066_v45 = vmul.f32 %v3180_v35, %v2057_v34 }
 0x2e1   :  { %v3184_v41 = vpop.eup %3183  ;;  %v2056_v43 = vmul.f32 %v3182_v39, %v2038_v24 }
 0x2e2   :  { %v3186_v44 = vpop.eup %3185  ;;  %v2064_v46 = vmul.f32 %v3184_v41, %v2055_v37  ;;  %v2068_v51 = vpack.c.bf16 %v2066_v45, %v2066_v45 }
 0x2e3   :  { %v2065_v48 = vmul.f32 %v3186_v44, %v2056_v43 }
 0x2e4   :  { %v2119_v52 = vsel %vm2117_vm3, %v2068_v51, 0 }
 0x2e5   :  { %v2067_v50 = vpack.c.bf16 %v2065_v48, %v2064_v46 }
 0x2e7   :  { %2668 = vmatpush3.bf16.msra.mxu1 %v2067_v50 }
 0x2e8   :  { %2669 = vmatprep.subr.bf16.mxu1 %v3188_v13 }
 0x2eb   :  { %2670 = vmatpush3.bf16.msra.mxu1 %v2119_v52 }
 0x2ec   :  { %2691 = vmatprep.subr.bf16.mxu1 %v3188_v13 }
 0x2ee   :  { %2672 = vmatmul.mubr.msk.bf16.vlgmr.msra.gmra.mrb[24].mxu1 %vm2101_vm4, %v3165_v53 }
 0x2ef   :  { %2692 = vmatpush3.bf16.msra.mxu1 %v2067_v50  ;;  %2675 = vmatprep.mubr.msk.bf16.mxu1 %vm3189_vm2, %v3188_v13 }
 0x2f0   :  { %2693 = vmatprep.subr.bf16.mxu1 %v3188_v13 }
 0x2f3   :  { %2694 = vmatpush3.bf16.msra.mxu1 %v2119_v52 }
 0x2f6   :  { %2676 = vmatmul.mubr.msk.bf16.gmra.mrb[28].mxu1 %vm2101_vm4, %v3166_v54 }
 0x2f7   :  { %2679 = vmatprep.mubr.msk.bf16.mxu1 %vm3189_vm2, %v3188_v13 }
 0x2fe   :  { %2680 = vmatmul.mubr.msk.bf16.gmra.mrb[32].mxu1 %vm2101_vm4, %v3167_v55 }
 0x2ff   :  { %2683 = vmatprep.mubr.msk.bf16.mxu1 %vm3189_vm2, %v3188_v13 }
 0x306   :  { %2684 = vmatmul.mubr.msk.bf16.gmra.mrb[36].mxu1 %vm2101_vm4, %v3168_v56 }
 0x307   :  { %2687 = vmatprep.mubr.msk.bf16.mxu1 %vm3189_vm2, %v3188_v13 }
 0x30e   :  { %2688 = vmatmul.mubr.msk.bf16.gmra.mrb[40].mxu1 %vm2101_vm4, %v3169_v57 }
 0x30f   :  { %2695 = vmatprep.mubr.msk.bf16.mxu1 %vm3189_vm2, %v3188_v13 }
 0x316   :  { %2696 = vmatmul.mubr.msk.bf16.vlgmr.msra.gmra.mrb[44].mxu1 %vm2101_vm4, %v3170_v58 }
 0x317   :  { %2699 = vmatprep.mubr.msk.bf16.mxu1 %vm3189_vm2, %v3188_v13 }
 0x31e   :  { %2700 = vmatmul.mubr.msk.bf16.gmra.mrb[48].mxu1 %vm2101_vm4, %v3171_v59 }
 0x31f   :  { %2703 = vmatprep.mubr.msk.bf16.mxu1 %vm3189_vm2, %v3188_v13 }
 0x326   :  { %2704 = vmatmul.mubr.msk.bf16.gmra.mrb[52].mxu1 %vm2101_vm4, %v3172_v60 }
 0x327   :  { %2707 = vmatprep.mubr.msk.bf16.mxu1 %vm3189_vm2, %v3188_v13 }
 0x32e   :  { %2708 = vmatmul.mubr.msk.bf16.gmra.mrb[56].mxu1 %vm2101_vm4, %v3173_v61 }
 0x32f   :  { %2711 = vmatprep.mubr.msk.bf16.mxu1 %vm3189_vm2, %v3188_v13 }
 0x336   :  { %2712 = vmatmul.mubr.msk.bf16.gmra.mrb[60].mxu1 %vm2101_vm4, %v3174_v62 }
 0x3c1   :  { %v2155_v63 = vpop.f32.mrb[24].mxu1 }
 0x3c2   :  { %v2193_v0 = vmul.f32 %v3907_v3, %v2155_v63  ;;  %v2673_v1 = vpop.f32.mrb[25].mxu1 }
 0x3c3   :  { %v2158_v2 = vpop.f32.mrb[26].mxu1 }
 0x3c4   :  { %2202 = vst [vmem:[%s4137_s6] sm:$0xff] %v2193_v0  ;;  %v2194_v4 = vmul.f32 %v3911_v7, %v2158_v2  ;;  %v2674_v6 = vpop.f32.mrb[27].mxu1 }
 0x3c6   :  { %2203 = vst [vmem:[%s4137_s6 + $0x10] sm:$0xff] %v2194_v4 }
 0x3c9   :  { %v2163_v8 = vpop.f32.mrb[28].mxu1 }
 0x3ca   :  { %v2195_v10 = vmul.f32 %v3919_v14, %v2163_v8  ;;  %v2677_v11 = vpop.f32.mrb[29].mxu1 }
 0x3cb   :  { %v2166_v12 = vpop.f32.mrb[30].mxu1 }
 0x3cc   :  { %2204 = vst [vmem:[%s4137_s6 + $0x20] sm:$0xff] %v2195_v10  ;;  %v2196_v3 = vmul.f32 %v3923_v18, %v2166_v12  ;;  %v2678_v13 = vpop.f32.mrb[31].mxu1 }
 0x3ce   :  { %2205 = vst [vmem:[%s4137_s6 + $0x30] sm:$0xff] %v2196_v3 }
 0x3d1   :  { %v2171_v7 = vpop.f32.mrb[32].mxu1 }
 0x3d2   :  { %v2197_v15 = vmul.f32 %v3931_v25, %v2171_v7  ;;  %v2681_v17 = vpop.f32.mrb[33].mxu1 }
 0x3d3   :  { %v2174_v19 = vpop.f32.mrb[34].mxu1 }
 0x3d4   :  { %2206 = vst [vmem:[%s4137_s6 + $0x40] sm:$0xff] %v2197_v15  ;;  %v2198_v14 = vmul.f32 %v3935_v29, %v2174_v19  ;;  %v2682_v21 = vpop.f32.mrb[35].mxu1 }
 0x3d6   :  { %2207 = vst [vmem:[%s4137_s6 + $0x50] sm:$0xff] %v2198_v14 }
 0x3d9   :  { %v2179_v18 = vpop.f32.mrb[36].mxu1 }
 0x3da   :  { %v2199_v22 = vmul.f32 %v3943_v36, %v2179_v18  ;;  %v2685_v23 = vpop.f32.mrb[37].mxu1 }
 0x3db   :  { %v2182_v24 = vpop.f32.mrb[38].mxu1 }
 0x3dc   :  { %2208 = vst [vmem:[%s4137_s6 + $0x60] sm:$0xff] %v2199_v22  ;;  %v2200_v25 = vmul.f32 %v3947_v40, %v2182_v24  ;;  %v2686_v26 = vpop.f32.mrb[39].mxu1 }
 0x3de   :  { %2209 = vst [vmem:[%s4137_s6 + $0x70] sm:$0xff] %v2200_v25 }
 0x3e1   :  { %v2187_v29 = vpop.f32.mrb[40].mxu1 }
 0x3e2   :  { %v2201_v28 = vmul.f32 %v3955_v47, %v2187_v29  ;;  %v2689_v30 = vpop.f32.mrb[41].mxu1 }
 0x3e3   :  { %v2190_v32 = vpop.f32.mrb[42].mxu1 }
 0x3e4   :  { %2210 = vst [vmem:[%s4137_s6 + $0x80] sm:$0xff] %v2201_v28  ;;  %v2690_v36 = vpop.f32.mrb[43].mxu1 }
 0x3e9   :  { %v2292_v33 = vpop.f32.mrb[44].mxu1 }
 0x3ea   :  { %v2330_v34 = vmul.f32 %v3909_v5, %v2292_v33  ;;  %v2697_v35 = vpop.f32.mrb[45].mxu1 }
 0x3eb   :  { %v2295_v40 = vpop.f32.mrb[46].mxu1 }
 0x3ec   :  { %2339 = vst [vmem:[%s4137_s6 + $0x8] sm:$0xff] %v2330_v34  ;;  %v2331_v37 = vmul.f32 %v3913_v9, %v2295_v40  ;;  %v2698_v39 = vpop.f32.mrb[47].mxu1 }
 0x3ee   :  { %2340 = vst [vmem:[%s4137_s6 + $0x18] sm:$0xff] %v2331_v37 }
 0x3f1   :  { %v2300_v47 = vpop.f32.mrb[48].mxu1 }
 0x3f2   :  { %v2332_v41 = vmul.f32 %v3921_v16, %v2300_v47  ;;  %v2701_v43 = vpop.f32.mrb[49].mxu1 }
 0x3f3   :  { %v2303_v44 = vpop.f32.mrb[50].mxu1 }
 0x3f4   :  { %2341 = vst [vmem:[%s4137_s6 + $0x28] sm:$0xff] %v2332_v41  ;;  %v2333_v5 = vmul.f32 %v3925_v20, %v2303_v44  ;;  %v2702_v45 = vpop.f32.mrb[51].mxu1 }
 0x3f6   :  { %2342 = vst [vmem:[%s4137_s6 + $0x38] sm:$0xff] %v2333_v5 }
 0x3f9   :  { %v2308_v9 = vpop.f32.mrb[52].mxu1 }
 0x3fa   :  { %v2334_v46 = vmul.f32 %v3933_v27, %v2308_v9  ;;  %v2705_v48 = vpop.f32.mrb[53].mxu1 }
 0x3fb   :  { %v2311_v50 = vpop.f32.mrb[54].mxu1 }
 0x3fc   :  { %2343 = vst [vmem:[%s4137_s6 + $0x48] sm:$0xff] %v2334_v46  ;;  %v2335_v16 = vmul.f32 %v3937_v31, %v2311_v50  ;;  %v2706_v51 = vpop.f32.mrb[55].mxu1 }
 0x3fe   :  { %2344 = vst [vmem:[%s4137_s6 + $0x58] sm:$0xff] %v2335_v16 }
 0x401   :  { %v2316_v20 = vpop.f32.mrb[56].mxu1 }
 0x402   :  { %v2336_v52 = vmul.f32 %v3945_v38, %v2316_v20  ;;  %v2709_v53 = vpop.f32.mrb[57].mxu1 }
 0x403   :  { %v2319_v54 = vpop.f32.mrb[58].mxu1 }
 0x404   :  { %2345 = vst [vmem:[%s4137_s6 + $0x68] sm:$0xff] %v2336_v52  ;;  %v2337_v27 = vmul.f32 %v3949_v42, %v2319_v54  ;;  %v2710_v55 = vpop.f32.mrb[59].mxu1 }
 0x406   :  { %2346 = vst [vmem:[%s4137_s6 + $0x78] sm:$0xff] %v2337_v27 }
 0x409   :  { %v2324_v31 = vpop.f32.mrb[60].mxu1 }
 0x40a   :  { %v2338_v56 = vmul.f32 %v3957_v49, %v2324_v31  ;;  %v2713_v57 = vpop.f32.mrb[61].mxu1 }
 0x40b   :  { %v2327_v58 = vpop.f32.mrb[62].mxu1 }
 0x40c   :  { %2347 = vst [vmem:[%s4137_s6 + $0x88] sm:$0xff] %v2338_v56  ;;  %v2714_v38 = vpop.f32.mrb[63].mxu1 }

</bundles_post_ra>
